<compile_context>
chip_gen: v7x
topology: tpu7x:2x2x1
jax: 0.10.0
libtpu: 0.0.40
codegen_flags: <defaults>
</compile_context>

<pallas_src>
import functools

import jax
import jax.numpy as jnp
from jax.experimental import pallas as pl
from jax.experimental.pallas import tpu as pltpu

_LANE = 128  # TPU lane width; channel dims are zero-padded to this.


def _mm(a, b):
    """MXU matmul with f32 accumulation; operand dtype chosen by the wrapper."""
    return jnp.dot(a, b, preferred_element_type=jnp.float32)


def _fused_sage_kernel(num_layers, row_tile, *refs):
    """All PESAGEconv layers fused into one kernel invocation.

    refs (inputs): adj (N,N), dinv (N,1), x_pad (N,LANE), emb_pad (N,LANE),
                   w_cat_0..w_cat_{L-1} (3*LANE, LANE), b_0..b_{L-1} (1, LANE)
    refs (output): o_ref (row_tile, LANE)   -- lane-dense, sliced in wrapper
    refs (scratch): lhs_scr (N, 3*LANE)     -- [ h | mean_agg(h) | mean_agg(emb) ]
    """
    adj_ref, dinv_ref, x_ref, e_ref = refs[:4]
    w_refs = refs[4:4 + num_layers]
    b_refs = refs[4 + num_layers:4 + 2 * num_layers]
    o_ref = refs[4 + 2 * num_layers]
    lhs_scr = refs[4 + 2 * num_layers + 1]

    n = adj_ref.shape[0]
    cdt = lhs_scr.dtype                      # compute / MXU-operand dtype
    i = pl.program_id(0)

    adj = adj_ref[...]                       # (N, N), already in compute dtype

    # Hoisted 1/deg lane-broadcast (JAX does not CSE broadcast_in_dim and the
    # Python layer loop unrolls, so do it once).
    dinvb = jnp.broadcast_to(dinv_ref[...], (n, _LANE))        # (N, LANE) f32

    # Layer-invariant PE aggregation, written once into lhs cols [2L, 3L).
    lhs_scr[:, pl.ds(2 * _LANE, _LANE)] = (
        dinvb * _mm(adj, e_ref[...])).astype(cdt)

    # Hidden layers are computed for ALL nodes (the next layer's aggregation
    # needs every node's activation); they never touch HBM.
    h = x_ref[...]                           # (N, LANE)
    for l in range(num_layers - 1):
        h_c = h if h.dtype == cdt else h.astype(cdt)
        lhs_scr[:, pl.ds(0, _LANE)] = h_c
        lhs_scr[:, pl.ds(_LANE, _LANE)] = (dinvb * _mm(adj, h_c)).astype(cdt)
        h = _mm(lhs_scr[...], w_refs[l][...]) + b_refs[l][...]
        h = jnp.maximum(h, 0.0)   # ReLU
        # TODO(synk): training-mode dropout not implemented (inference path).

    # Output layer: only this grid step's row block.
    start = pl.multiple_of(i * row_tile, row_tile)
    h_c = h if h.dtype == cdt else h.astype(cdt)
    lhs_scr[:, pl.ds(0, _LANE)] = h_c
    adj_rows = adj_ref[pl.ds(start, row_tile), :]                # (TN, N)
    dinv_rows = dinv_ref[pl.ds(start, row_tile), :]              # (TN, 1)
    lhs_scr[pl.ds(start, row_tile), pl.ds(_LANE, _LANE)] = (
        dinv_rows * _mm(adj_rows, h_c)).astype(cdt)
    out = (_mm(lhs_scr[pl.ds(start, row_tile), :], w_refs[-1][...])
           + b_refs[-1][...])
    o_ref[...] = out.astype(o_ref.dtype)


def _pad_cols(a, width):
    pad = width - a.shape[-1]
    return a if pad == 0 else jnp.pad(a, ((0, 0), (0, pad)))


def sage_forward(params, x, adj_t, embeddings, *, num_row_blocks=1,
                 use_bf16=False):
    """SAGE.forward (eval mode) fully fused into a single pallas_call.

    num_row_blocks: keep 1 on single-TensorCore chips (v5e/v6e); >1 only pays
    off if the axis really maps onto multiple TensorCores (v7x).
    """
    N = x.shape[0]
    num_layers = len(params)
    out_ch = params[-1]["w_l"].shape[1]
    cdt = jnp.bfloat16 if use_bf16 else jnp.float32
    itemsize = 2 if use_bf16 else 4

    assert all(max(p["w_l"].shape[0], p["w_l"].shape[1],
                   p["w_pe"].shape[0]) <= _LANE for p in params), \
        "this fused kernel assumes all channel dims <= 128"

    if (num_row_blocks < 1 or N % num_row_blocks != 0
            or (N // num_row_blocks) % 8 != 0):
        num_row_blocks = 1
    row_tile = N // num_row_blocks

    # Mean aggregation: pass raw adjacency + 1/deg; kernel scales post-matmul
    # (avoids materializing a second N^2 "a_norm" array in HBM).
    deg = jnp.clip(jnp.sum(adj_t.astype(jnp.float32), axis=1, keepdims=True),
                   1.0, None)
    dinv = (1.0 / deg).astype(jnp.float32)                       # (N, 1)

    # Any bf16 casts happen ONCE here, not per layer inside the kernel.
    adj_c = adj_t.astype(cdt)                                    # (N, N)
    x_p = _pad_cols(x.astype(jnp.float32), _LANE).astype(cdt)    # (N, LANE)
    e_p = _pad_cols(embeddings.astype(jnp.float32), _LANE).astype(cdt)

    # Fuse the three projections of each layer into one K = 3*LANE matmul:
    #   lhs = [h | mean_agg(h) | mean_agg(emb)],  W_cat = [W_l; W_r; W_pe].
    # Every layer (incl. the last) keeps a lane-dense 128-wide output so the
    # HBM writeback uses unmasked full-lane stores; the wrapper slices the
    # real out_channels afterwards.
    w_cats, biases = [], []
    for p in params:
        def _pad_w(w):
            return jnp.pad(w.astype(jnp.float32),
                           ((0, _LANE - w.shape[0]), (0, _LANE - w.shape[1])))
        w_cats.append(jnp.concatenate(
            [_pad_w(p["w_l"]), _pad_w(p["w_r"]), _pad_w(p["w_pe"])],
            axis=0).astype(cdt))
        biases.append(jnp.pad(p["b"].astype(jnp.float32),
                              ((0, 0), (0, _LANE - p["b"].shape[1]))))

    kernel = functools.partial(_fused_sage_kernel, num_layers, row_tile)

    in_specs = (
        [pl.BlockSpec((N, N), lambda i: (0, 0)),         # adj (DMA'd once)
         pl.BlockSpec((N, 1), lambda i: (0, 0)),         # 1/deg
         pl.BlockSpec((N, _LANE), lambda i: (0, 0)),     # x (padded)
         pl.BlockSpec((N, _LANE), lambda i: (0, 0))]     # embeddings (padded)
        + [pl.BlockSpec(w.shape, lambda i: (0, 0)) for w in w_cats]
        + [pl.BlockSpec(b.shape, lambda i: (0, 0)) for b in biases])

    # VMEM budget: grid-invariant inputs (double-buffered by the pipeline),
    # the (N, 3*LANE) lhs slab and the lane-dense output block.
    in_bytes = (N * N + 2 * N * _LANE) * itemsize + N * 4
    in_bytes += sum(int(w.size) * itemsize for w in w_cats)
    in_bytes += sum(int(b.size) * 4 for b in biases)
    need = (2 * in_bytes + N * 3 * _LANE * itemsize
            + 2 * row_tile * _LANE * 4)
    vmem_limit = min(max(int(need * 3 // 2) + (2 << 20), 32 << 20), 64 << 20)

    flops = (2 * N * N * _LANE * (num_layers + 1)
             + 2 * N * 3 * _LANE * _LANE * num_layers) * num_row_blocks
    bytes_accessed = in_bytes + N * _LANE * 4

    out_pad = pl.pallas_call(
        kernel,
        out_shape=jax.ShapeDtypeStruct((N, _LANE), jnp.float32),
        grid_spec=pltpu.PrefetchScalarGridSpec(
            num_scalar_prefetch=0,
            grid=(num_row_blocks,),
            in_specs=in_specs,
            out_specs=pl.BlockSpec((row_tile, _LANE), lambda i: (i, 0)),
            scratch_shapes=[pltpu.VMEM((N, 3 * _LANE), cdt)],
        ),
        compiler_params=pltpu.CompilerParams(
            dimension_semantics=("parallel",),
            vmem_limit_bytes=vmem_limit),
        cost_estimate=pl.CostEstimate(flops=int(flops), transcendentals=0,
                                      bytes_accessed=int(bytes_accessed)),
    )(adj_c, dinv, x_p, e_p, *w_cats, *biases)

    return out_pad[:, :out_ch]


def _ref_forward(params, x, adj_t, embeddings):
    """Pure-JAX fp32 reference for correctness checking."""
    deg = jnp.clip(jnp.sum(adj_t, axis=1, keepdims=True), 1.0, None)
    a_norm = adj_t / deg
    n_layers = len(params)
    for li, p in enumerate(params):
        agg_x = a_norm @ x
        agg_e = a_norm @ embeddings
        x = x @ p["w_l"] + agg_x @ p["w_r"] + agg_e @ p["w_pe"] + p["b"]
        if li != n_layers - 1:
            x = jnp.maximum(x, 0.0)
    return x


def _init_params(key, in_channels, hidden_channels, out_channels, pe_dim,
                 num_layers):
    """Deterministic glorot-uniform-ish init for every PESAGEconv layer."""
    dims = ([(in_channels, hidden_channels)]
            + [(hidden_channels, hidden_channels)] * (num_layers - 2)
            + [(hidden_channels, out_channels)])
    params = []
    for cin, cout in dims:
        key, k1, k2, k3 = jax.random.split(key, 4)
        s_x = (6.0 / (cin + cout)) ** 0.5
        s_p = (6.0 / (pe_dim + cout)) ** 0.5
        params.append({
            "w_l": jax.random.uniform(k1, (cin, cout), jnp.float32, -s_x, s_x),
            "w_r": jax.random.uniform(k2, (cin, cout), jnp.float32, -s_x, s_x),
            "w_pe": jax.random.uniform(k3, (pe_dim, cout), jnp.float32,
                                       -s_p, s_p),
            "b": jnp.zeros((1, cout), jnp.float32),
        })
    return params


if __name__ == "__main__":
    key = jax.random.PRNGKey(0)

    N = 128            # number of nodes
    IN_CH = 16         # in_channels
    HID_CH = 32        # hidden_channels
    OUT_CH = 8         # out_channels
    PE_DIM = 16        # positional-embedding dim
    NUM_LAYERS = 3     # -> convs = [in->hid, hid->hid], output = hid->out

    key, kx, ka, ke, kp = jax.random.split(key, 5)
    x = jax.random.normal(kx, (N, IN_CH), jnp.float32)
    adj_t = (jax.random.uniform(ka, (N, N)) < 0.1).astype(jnp.float32)
    adj_t = adj_t + jnp.eye(N, dtype=jnp.float32)      # add self loops
    embeddings = jax.random.normal(ke, (N, PE_DIM), jnp.float32)

    params = _init_params(kp, IN_CH, HID_CH, OUT_CH, PE_DIM, NUM_LAYERS)

    out = sage_forward(params, x, adj_t, embeddings)   # fp32 path
    out = jax.block_until_ready(out)

    ref = _ref_forward(params, x, adj_t, embeddings)
    assert out.shape == (N, OUT_CH)
    # Tolerance check is only valid for the fp32 path (use_bf16=False).
    assert jnp.allclose(out, ref, atol=1e-4, rtol=1e-4)

    print("KERNEL_OK")
</pallas_src>

<mosaic_0001>
module attributes {stable_mosaic.version = 11 : i64} {
  func.func @_fused_sage_kernel(%arg0: i32, %arg1: memref<128x128xf32, #tpu.memory_space<vmem>>, %arg2: memref<128x1xf32, #tpu.memory_space<vmem>>, %arg3: memref<128x128xf32, #tpu.memory_space<vmem>>, %arg4: memref<128x128xf32, #tpu.memory_space<vmem>>, %arg5: memref<384x128xf32, #tpu.memory_space<vmem>>, %arg6: memref<384x128xf32, #tpu.memory_space<vmem>>, %arg7: memref<384x128xf32, #tpu.memory_space<vmem>>, %arg8: memref<1x128xf32, #tpu.memory_space<vmem>>, %arg9: memref<1x128xf32, #tpu.memory_space<vmem>>, %arg10: memref<1x128xf32, #tpu.memory_space<vmem>>, %arg11: memref<128x128xf32, #tpu.memory_space<vmem>>, %arg12: memref<128x384xf32, #tpu.memory_space<vmem>>) attributes {dimension_semantics = [#tpu.dimension_semantics<parallel>], iteration_bounds = array<i64: 1>, scalar_prefetch = 0 : i64, scratch_operands = 1 : i64, tpu.core_type = #tpu.core_type<tc>, window_params = [{pipeline_mode = #tpu.pipeline_mode<synchronous>, transform_indices = @transform_0, window_bounds = array<i64: 128, 128>}, {pipeline_mode = #tpu.pipeline_mode<synchronous>, transform_indices = @transform_1, window_bounds = array<i64: 128, 1>}, {pipeline_mode = #tpu.pipeline_mode<synchronous>, transform_indices = @transform_2, window_bounds = array<i64: 128, 128>}, {pipeline_mode = #tpu.pipeline_mode<synchronous>, transform_indices = @transform_3, window_bounds = array<i64: 128, 128>}, {pipeline_mode = #tpu.pipeline_mode<synchronous>, transform_indices = @transform_4, window_bounds = array<i64: 384, 128>}, {pipeline_mode = #tpu.pipeline_mode<synchronous>, transform_indices = @transform_5, window_bounds = array<i64: 384, 128>}, {pipeline_mode = #tpu.pipeline_mode<synchronous>, transform_indices = @transform_6, window_bounds = array<i64: 384, 128>}, {pipeline_mode = #tpu.pipeline_mode<synchronous>, transform_indices = @transform_7, window_bounds = array<i64: 1, 128>}, {pipeline_mode = #tpu.pipeline_mode<synchronous>, transform_indices = @transform_8, window_bounds = array<i64: 1, 128>}, {pipeline_mode = #tpu.pipeline_mode<synchronous>, transform_indices = @transform_9, window_bounds = array<i64: 1, 128>}, {transform_indices = @transform_10, window_bounds = array<i64: 128, 128>}]} {
    %c0 = arith.constant 0 : index
    %c0_0 = arith.constant 0 : index
    %0 = vector.load %arg1[%c0, %c0_0] : memref<128x128xf32, #tpu.memory_space<vmem>>, vector<128x128xf32>
    %c0_1 = arith.constant 0 : index
    %c0_2 = arith.constant 0 : index
    %1 = vector.load %arg2[%c0_1, %c0_2] : memref<128x1xf32, #tpu.memory_space<vmem>>, vector<128x1xf32>
    %2 = vector.shape_cast %1 : vector<128x1xf32> to vector<128x1xf32>
    %3 = vector.broadcast %2 : vector<128x1xf32> to vector<128x128xf32>
    %c0_3 = arith.constant 0 : index
    %c0_4 = arith.constant 0 : index
    %4 = vector.load %arg4[%c0_3, %c0_4] : memref<128x128xf32, #tpu.memory_space<vmem>>, vector<128x128xf32>
    %cst = arith.constant dense<0.000000e+00> : vector<128x128xf32>
    %5 = tpu.matmul %0, %4, %cst {dimension_numbers = #tpu.dot_dimension_numbers<[1], [0], [0], [1], [0, 0, 1, 1], [], []>} : vector<128x128xf32>, vector<128x128xf32>, vector<128x128xf32> -> vector<128x128xf32>
    %6 = arith.mulf %3, %5 : vector<128x128xf32>
    %c0_5 = arith.constant 0 : index
    %c256 = arith.constant 256 : index
    %7 = vector.load %arg12[%c0_5, %c256] : memref<128x384xf32, #tpu.memory_space<vmem>>, vector<128x128xf32>
    tpu.vector_store %arg12[%c0_5, %c256], %6 {strides = array<i32>} : memref<128x384xf32, #tpu.memory_space<vmem>>, vector<128x128xf32>,
    %c0_6 = arith.constant 0 : index
    %c0_7 = arith.constant 0 : index
    %8 = vector.load %arg3[%c0_6, %c0_7] : memref<128x128xf32, #tpu.memory_space<vmem>>, vector<128x128xf32>
    %c0_8 = arith.constant 0 : index
    %c0_9 = arith.constant 0 : index
    %9 = vector.load %arg12[%c0_8, %c0_9] : memref<128x384xf32, #tpu.memory_space<vmem>>, vector<128x128xf32>
    tpu.vector_store %arg12[%c0_8, %c0_9], %8 {strides = array<i32>} : memref<128x384xf32, #tpu.memory_space<vmem>>, vector<128x128xf32>,
    %cst_10 = arith.constant dense<0.000000e+00> : vector<128x128xf32>
    %10 = tpu.matmul %0, %8, %cst_10 {dimension_numbers = #tpu.dot_dimension_numbers<[1], [0], [0], [1], [0, 0, 1, 1], [], []>} : vector<128x128xf32>, vector<128x128xf32>, vector<128x128xf32> -> vector<128x128xf32>
    %11 = arith.mulf %3, %10 : vector<128x128xf32>
    %c0_11 = arith.constant 0 : index
    %c128 = arith.constant 128 : index
    %12 = vector.load %arg12[%c0_11, %c128] : memref<128x384xf32, #tpu.memory_space<vmem>>, vector<128x128xf32>
    tpu.vector_store %arg12[%c0_11, %c128], %11 {strides = array<i32>} : memref<128x384xf32, #tpu.memory_space<vmem>>, vector<128x128xf32>,
    %c0_12 = arith.constant 0 : index
    %c0_13 = arith.constant 0 : index
    %13 = vector.load %arg12[%c0_12, %c0_13] : memref<128x384xf32, #tpu.memory_space<vmem>>, vector<128x384xf32>
    %c0_14 = arith.constant 0 : index
    %c0_15 = arith.constant 0 : index
    %14 = vector.load %arg5[%c0_14, %c0_15] : memref<384x128xf32, #tpu.memory_space<vmem>>, vector<384x128xf32>
    %cst_16 = arith.constant dense<0.000000e+00> : vector<128x128xf32>
    %15 = tpu.matmul %13, %14, %cst_16 {dimension_numbers = #tpu.dot_dimension_numbers<[1], [0], [0], [1], [0, 0, 1, 1], [], []>} : vector<128x384xf32>, vector<384x128xf32>, vector<128x128xf32> -> vector<128x128xf32>
    %c0_17 = arith.constant 0 : index
    %c0_18 = arith.constant 0 : index
    %16 = vector.load %arg8[%c0_17, %c0_18] : memref<1x128xf32, #tpu.memory_space<vmem>>, vector<1x128xf32>
    %17 = vector.broadcast %16 : vector<1x128xf32> to vector<128x128xf32>
    %18 = arith.addf %15, %17 : vector<128x128xf32>
    %cst_19 = arith.constant 0.000000e+00 : f32
    %19 = vector.broadcast %cst_19 : f32 to vector<128x128xf32>
    %20 = arith.maximumf %18, %19 : vector<128x128xf32>
    %c0_20 = arith.constant 0 : index
    %c0_21 = arith.constant 0 : index
    %21 = vector.load %arg12[%c0_20, %c0_21] : memref<128x384xf32, #tpu.memory_space<vmem>>, vector<128x128xf32>
    tpu.vector_store %arg12[%c0_20, %c0_21], %20 {strides = array<i32>} : memref<128x384xf32, #tpu.memory_space<vmem>>, vector<128x128xf32>,
    %cst_22 = arith.constant dense<0.000000e+00> : vector<128x128xf32>
    %22 = tpu.matmul %0, %20, %cst_22 {dimension_numbers = #tpu.dot_dimension_numbers<[1], [0], [0], [1], [0, 0, 1, 1], [], []>} : vector<128x128xf32>, vector<128x128xf32>, vector<128x128xf32> -> vector<128x128xf32>
    %23 = arith.mulf %3, %22 : vector<128x128xf32>
    %c0_23 = arith.constant 0 : index
    %c128_24 = arith.constant 128 : index
    %24 = vector.load %arg12[%c0_23, %c128_24] : memref<128x384xf32, #tpu.memory_space<vmem>>, vector<128x128xf32>
    tpu.vector_store %arg12[%c0_23, %c128_24], %23 {strides = array<i32>} : memref<128x384xf32, #tpu.memory_space<vmem>>, vector<128x128xf32>,
    %c0_25 = arith.constant 0 : index
    %c0_26 = arith.constant 0 : index
    %25 = vector.load %arg12[%c0_25, %c0_26] : memref<128x384xf32, #tpu.memory_space<vmem>>, vector<128x384xf32>
    %c0_27 = arith.constant 0 : index
    %c0_28 = arith.constant 0 : index
    %26 = vector.load %arg6[%c0_27, %c0_28] : memref<384x128xf32, #tpu.memory_space<vmem>>, vector<384x128xf32>
    %cst_29 = arith.constant dense<0.000000e+00> : vector<128x128xf32>
    %27 = tpu.matmul %25, %26, %cst_29 {dimension_numbers = #tpu.dot_dimension_numbers<[1], [0], [0], [1], [0, 0, 1, 1], [], []>} : vector<128x384xf32>, vector<384x128xf32>, vector<128x128xf32> -> vector<128x128xf32>
    %c0_30 = arith.constant 0 : index
    %c0_31 = arith.constant 0 : index
    %28 = vector.load %arg9[%c0_30, %c0_31] : memref<1x128xf32, #tpu.memory_space<vmem>>, vector<1x128xf32>
    %29 = vector.broadcast %28 : vector<1x128xf32> to vector<128x128xf32>
    %30 = arith.addf %27, %29 : vector<128x128xf32>
    %cst_32 = arith.constant 0.000000e+00 : f32
    %31 = vector.broadcast %cst_32 : f32 to vector<128x128xf32>
    %32 = arith.maximumf %30, %31 : vector<128x128xf32>
    %c128_i32 = arith.constant 128 : i32
    %33 = arith.muli %arg0, %c128_i32 : i32
    %34 = tpu.assume_multiple %33, 128 : i32
    %c0_33 = arith.constant 0 : index
    %c0_34 = arith.constant 0 : index
    %35 = vector.load %arg12[%c0_33, %c0_34] : memref<128x384xf32, #tpu.memory_space<vmem>>, vector<128x128xf32>
    tpu.vector_store %arg12[%c0_33, %c0_34], %32 {strides = array<i32>} : memref<128x384xf32, #tpu.memory_space<vmem>>, vector<128x128xf32>,
    %36 = arith.index_cast %34 : i32 to index
    %c0_35 = arith.constant 0 : index
    %37 = vector.load %arg1[%36, %c0_35] : memref<128x128xf32, #tpu.memory_space<vmem>>, vector<128x128xf32>
    %38 = arith.index_cast %34 : i32 to index
    %c0_36 = arith.constant 0 : index
    %39 = vector.load %arg2[%38, %c0_36] : memref<128x1xf32, #tpu.memory_space<vmem>>, vector<128x1xf32>
    %cst_37 = arith.constant dense<0.000000e+00> : vector<128x128xf32>
    %40 = tpu.matmul %37, %32, %cst_37 {dimension_numbers = #tpu.dot_dimension_numbers<[1], [0], [0], [1], [0, 0, 1, 1], [], []>} : vector<128x128xf32>, vector<128x128xf32>, vector<128x128xf32> -> vector<128x128xf32>
    %41 = vector.broadcast %39 : vector<128x1xf32> to vector<128x128xf32>
    %42 = arith.mulf %41, %40 : vector<128x128xf32>
    %43 = arith.index_cast %34 : i32 to index
    %c128_38 = arith.constant 128 : index
    %44 = vector.load %arg12[%43, %c128_38] : memref<128x384xf32, #tpu.memory_space<vmem>>, vector<128x128xf32>
    tpu.vector_store %arg12[%43, %c128_38], %42 {strides = array<i32>} : memref<128x384xf32, #tpu.memory_space<vmem>>, vector<128x128xf32>,
    %45 = arith.index_cast %34 : i32 to index
    %c0_39 = arith.constant 0 : index
    %46 = vector.load %arg12[%45, %c0_39] : memref<128x384xf32, #tpu.memory_space<vmem>>, vector<128x384xf32>
    %c0_40 = arith.constant 0 : index
    %c0_41 = arith.constant 0 : index
    %47 = vector.load %arg7[%c0_40, %c0_41] : memref<384x128xf32, #tpu.memory_space<vmem>>, vector<384x128xf32>
    %cst_42 = arith.constant dense<0.000000e+00> : vector<128x128xf32>
    %48 = tpu.matmul %46, %47, %cst_42 {dimension_numbers = #tpu.dot_dimension_numbers<[1], [0], [0], [1], [0, 0, 1, 1], [], []>} : vector<128x384xf32>, vector<384x128xf32>, vector<128x128xf32> -> vector<128x128xf32>
    %c0_43 = arith.constant 0 : index
    %c0_44 = arith.constant 0 : index
    %49 = vector.load %arg10[%c0_43, %c0_44] : memref<1x128xf32, #tpu.memory_space<vmem>>, vector<1x128xf32>
    %50 = vector.broadcast %49 : vector<1x128xf32> to vector<128x128xf32>
    %51 = arith.addf %48, %50 : vector<128x128xf32>
    %c0_45 = arith.constant 0 : index
    %c0_46 = arith.constant 0 : index
    %52 = vector.load %arg11[%c0_45, %c0_46] : memref<128x128xf32, #tpu.memory_space<vmem>>, vector<128x128xf32>
    tpu.vector_store %arg11[%c0_45, %c0_46], %51 {strides = array<i32>} : memref<128x128xf32, #tpu.memory_space<vmem>>, vector<128x128xf32>,
    return
  }
  func.func @transform_0(%arg0: i32) -> (i32, i32) {
    %c0_i32 = arith.constant 0 : i32
    %c0_i32_0 = arith.constant 0 : i32
    %c0_i32_1 = arith.constant 0 : i32
    return %c0_i32, %c0_i32_0 : i32, i32
  }
  func.func @transform_1(%arg0: i32) -> (i32, i32) {
    %c0_i32 = arith.constant 0 : i32
    %c0_i32_0 = arith.constant 0 : i32
    %c0_i32_1 = arith.constant 0 : i32
    return %c0_i32, %c0_i32_0 : i32, i32
  }
  func.func @transform_2(%arg0: i32) -> (i32, i32) {
    %c0_i32 = arith.constant 0 : i32
    %c0_i32_0 = arith.constant 0 : i32
    %c0_i32_1 = arith.constant 0 : i32
    return %c0_i32, %c0_i32_0 : i32, i32
  }
  func.func @transform_3(%arg0: i32) -> (i32, i32) {
    %c0_i32 = arith.constant 0 : i32
    %c0_i32_0 = arith.constant 0 : i32
    %c0_i32_1 = arith.constant 0 : i32
    return %c0_i32, %c0_i32_0 : i32, i32
  }
  func.func @transform_4(%arg0: i32) -> (i32, i32) {
    %c0_i32 = arith.constant 0 : i32
    %c0_i32_0 = arith.constant 0 : i32
    %c0_i32_1 = arith.constant 0 : i32
    return %c0_i32, %c0_i32_0 : i32, i32
  }
  func.func @transform_5(%arg0: i32) -> (i32, i32) {
    %c0_i32 = arith.constant 0 : i32
    %c0_i32_0 = arith.constant 0 : i32
    %c0_i32_1 = arith.constant 0 : i32
    return %c0_i32, %c0_i32_0 : i32, i32
  }
  func.func @transform_6(%arg0: i32) -> (i32, i32) {
    %c0_i32 = arith.constant 0 : i32
    %c0_i32_0 = arith.constant 0 : i32
    %c0_i32_1 = arith.constant 0 : i32
    return %c0_i32, %c0_i32_0 : i32, i32
  }
  func.func @transform_7(%arg0: i32) -> (i32, i32) {
    %c0_i32 = arith.constant 0 : i32
    %c0_i32_0 = arith.constant 0 : i32
    %c0_i32_1 = arith.constant 0 : i32
    return %c0_i32, %c0_i32_0 : i32, i32
  }
  func.func @transform_8(%arg0: i32) -> (i32, i32) {
    %c0_i32 = arith.constant 0 : i32
    %c0_i32_0 = arith.constant 0 : i32
    %c0_i32_1 = arith.constant 0 : i32
    return %c0_i32, %c0_i32_0 : i32, i32
  }
  func.func @transform_9(%arg0: i32) -> (i32, i32) {
    %c0_i32 = arith.constant 0 : i32
    %c0_i32_0 = arith.constant 0 : i32
    %c0_i32_1 = arith.constant 0 : i32
    return %c0_i32, %c0_i32_0 : i32, i32
  }
  func.func @transform_10(%arg0: i32) -> (i32, i32) {
    %c0_i32 = arith.constant 0 : i32
    %c0_i32_0 = arith.constant 0 : i32
    return %arg0, %c0_i32 : i32, i32
  }
}

</mosaic_0001>

<bundles_post_ra>
// kernel: tpu_custom_call.1
= control target key start
LH: loop header
LB: loop body
LE: loop exit
PB: predicated region body
PF: predicated region fallthrough
CT: control target
= control target key end

     0   :  { %15 = vsyncpa [#allocation4], 0  ;;  %s4779_s0 = inlined_call_operand.vmem [shape: f32[128,128], index: 0, kind: input, shape index: {}]   ;;  %s4780_s1 = inlined_call_operand.vmem [shape: f32[128,1], index: 1, kind: input, shape index: {}]   ;;  %s4781_s2 = inlined_call_operand.hbm [shape: f32[128,128], index: 2, kind: input, shape index: {}]   ;;  %s4782_s3 = inlined_call_operand.hbm [shape: f32[128,128], index: 3, kind: input, shape index: {}]   ;;  %s4783_s4 = inlined_call_operand.hbm [shape: f32[384,128], index: 4, kind: input, shape index: {}]   ;;  %s4784_s5 = inlined_call_operand.hbm [shape: f32[384,128], index: 5, kind: input, shape index: {}]   ;;  %s4785_s6 = inlined_call_operand.hbm [shape: f32[384,128], index: 6, kind: input, shape index: {}]   ;;  %s4786_s7 = inlined_call_operand.vmem [shape: f32[1,128], index: 7, kind: input, shape index: {}]   ;;  %s4787_s8 = inlined_call_operand.vmem [shape: f32[1,128], index: 8, kind: input, shape index: {}]   ;;  %s4788_s9 = inlined_call_operand.vmem [shape: f32[1,128], index: 9, kind: input, shape index: {}]   ;;  %s4789_s10 = inlined_call_operand.hbm [shape: f32[128,128], index: 10, kind: output, shape index: {}]  }
   0x1   :  { %16 = vsyncpa [#allocation7], 0 }
   0x2   :  { %17 = vsyncpa [#allocation10], 0 }
   0x3   :  { %18 = vsyncpa [#allocation5], 0  ;;  %s3709_s13 = smov [#allocation6]   ;;  %s3710_s15 = smov [#allocation9]  }
   0x4   :  { %s40_s14 = sshll.u32 %s3709_s13, 4  ;;  %s64_s16 = sshll.u32 %s3710_s15, 4  ;;  %s41_s14 = int_to_ptr.vmem [resolvable:$true] %s40_s14  ;;  %s3773_s16 = int_to_ptr.vmem [resolvable:$true] %s64_s16 }
   0x5   :  { %s3569_s19 = scalar_lea.hbm %s4782_s3, 2048 }
   0x6   :  { %p3570_p0 = scmp.ne.s32.totalorder %s4782_s3, %s3569_s19  ;;  %p3573_p1 = scmp.lt.u32.totalorder %s3569_s19, %s4782_s3 }
   0x8   :  { %p3575_p2 = pnand %p3573_p1, %p3570_p0 }
   0xa   :  { %3578 = shalt.err (!%p3575_p2)
}
   0xb   :  { %s3579_s24 = scalar_lea.vmem %s41_s14, 2048  ;;  %p3584_p4 = scmp.lt.s32.totalorder %s41_s14, %s41_s14 }
   0xc   :  { %p3580_p3 = scmp.ne.s32.totalorder %s41_s14, %s3579_s24  ;;  %p3585_p5 = scmp.lt.s32.totalorder %s3579_s24, %s3579_s24 }
   0xe   :  { %p3586_p6 = por %p3585_p5, %p3584_p4 }
  0x10   :  { %p3587_p7 = pnand %p3586_p6, %p3580_p3 }
  0x12   :  { %3590 = shalt.err (!%p3587_p7)
}
  0x13   :  { %s3711_s25 = smov 128   ;;  %s3712_s26 = smov 8  }
  0x14   :  { %46 = dma.hbm_to_vmem [thread:$0]  %s4782_s3, 2048, %s41_s14, [#allocation7], %s3711_s25, %s3711_s25, %s3712_s26  }
  0x15   :  { %s3591_s11 = scalar_lea.hbm %s4784_s5, 6144 }
  0x16   :  { %p3592_p8 = scmp.ne.s32.totalorder %s4784_s5, %s3591_s11  ;;  %p3595_p9 = scmp.lt.u32.totalorder %s3591_s11, %s4784_s5 }
  0x18   :  { %p3597_p10 = pnand %p3595_p9, %p3592_p8 }
  0x1a   :  { %3600 = shalt.err (!%p3597_p10)
}
  0x1b   :  { %s3601_s18 = scalar_lea.vmem %s3773_s16, 6144  ;;  %p3606_p12 = scmp.lt.s32.totalorder %s3773_s16, %s3773_s16 }
  0x1c   :  { %p3602_p11 = scmp.ne.s32.totalorder %s3773_s16, %s3601_s18  ;;  %p3607_p13 = scmp.lt.s32.totalorder %s3601_s18, %s3601_s18 }
  0x1e   :  { %p3608_p0 = por %p3607_p13, %p3606_p12 }
  0x20   :  { %p3609_p1 = pnand %p3608_p0, %p3602_p11 }
  0x22   :  { %3612 = shalt.err (!%p3609_p1)
}
  0x23   :  { %70 = dma.hbm_to_vmem [thread:$0]  %s4784_s5, 6144, %s3773_s16, [#allocation10], %s3711_s25, %s3711_s25, %s3712_s26  }
  0x24   :  { %s3713_s19 = smov [#allocation3]   ;;  %s3714_s21 = smov [#allocation8]  }
  0x25   :  { %s28_s20 = sshll.u32 %s3713_s19, 4  ;;  %s52_s22 = sshll.u32 %s3714_s21, 4  ;;  %s29_s20 = int_to_ptr.vmem [resolvable:$true] %s28_s20  ;;  %s3810_s22 = int_to_ptr.vmem [resolvable:$true] %s52_s22 }
  0x26   :  { %s3613_s27 = scalar_lea.hbm %s4781_s2, 2048 }
  0x27   :  { %p3614_p2 = scmp.ne.s32.totalorder %s4781_s2, %s3613_s27  ;;  %p3617_p3 = scmp.lt.u32.totalorder %s3613_s27, %s4781_s2 }
  0x29   :  { %p3619_p4 = pnand %p3617_p3, %p3614_p2 }
  0x2b   :  { %3622 = shalt.err (!%p3619_p4)
}
  0x2c   :  { %s3623_s5 = scalar_lea.vmem %s29_s20, 2048  ;;  %p3628_p6 = scmp.lt.s32.totalorder %s29_s20, %s29_s20 }
  0x2d   :  { %p3624_p5 = scmp.ne.s32.totalorder %s29_s20, %s3623_s5  ;;  %p3629_p7 = scmp.lt.s32.totalorder %s3623_s5, %s3623_s5 }
  0x2f   :  { %p3630_p8 = por %p3629_p7, %p3628_p6 }
  0x31   :  { %p3631_p9 = pnand %p3630_p8, %p3624_p5 }
  0x33   :  { %3634 = shalt.err (!%p3631_p9)
}
  0x34   :  { %34 = dma.hbm_to_vmem [thread:$0]  %s4781_s2, 2048, %s29_s20, [#allocation4], %s3711_s25, %s3711_s25, %s3712_s26  }
  0x35   :  { %s3635_s17 = scalar_lea.hbm %s4783_s4, 6144 }
  0x36   :  { %p3636_p10 = scmp.ne.s32.totalorder %s4783_s4, %s3635_s17  ;;  %p3639_p11 = scmp.lt.u32.totalorder %s3635_s17, %s4783_s4 }
  0x38   :  { %p3641_p12 = pnand %p3639_p11, %p3636_p10 }
  0x3a   :  { %3644 = shalt.err (!%p3641_p12)
}
  0x3b   :  { %s3645_s21 = scalar_lea.vmem %s3810_s22, 6144  ;;  %p3650_p0 = scmp.lt.s32.totalorder %s3810_s22, %s3810_s22 }
  0x3c   :  { %p3646_p13 = scmp.ne.s32.totalorder %s3810_s22, %s3645_s21  ;;  %p3651_p1 = scmp.lt.s32.totalorder %s3645_s21, %s3645_s21 }
  0x3e   :  { %p3652_p2 = por %p3651_p1, %p3650_p0 }
  0x40   :  { %p3653_p3 = pnand %p3652_p2, %p3646_p13 }
  0x42   :  { %3656 = shalt.err (!%p3653_p3)
}
  0x43   :  { %58 = dma.hbm_to_vmem [thread:$0]  %s4783_s4, 6144, %s3810_s22, [#allocation7], %s3711_s25, %s3711_s25, %s3712_s26  }
  0x44   :  { %s3715_s23 = smov [#allocation11]   ;;  %s3657_s29 = scalar_lea.hbm %s4785_s6, 6144 }
  0x45   :  { %s76_s24 = sshll.u32 %s3715_s23, 4  ;;  %p3658_p4 = scmp.ne.s32.totalorder %s4785_s6, %s3657_s29  ;;  %s77_s24 = int_to_ptr.vmem [resolvable:$true] %s76_s24 }
  0x46   :  { %p3661_p5 = scmp.lt.u32.totalorder %s3657_s29, %s4785_s6 }
  0x48   :  { %p3663_p6 = pnand %p3661_p5, %p3658_p4 }
  0x4a   :  { %3666 = shalt.err (!%p3663_p6)
}
  0x4b   :  { %s3667_s12 = scalar_lea.vmem %s77_s24, 6144  ;;  %p3672_p8 = scmp.lt.s32.totalorder %s77_s24, %s77_s24 }
  0x4c   :  { %p3668_p7 = scmp.ne.s32.totalorder %s77_s24, %s3667_s12  ;;  %p3673_p9 = scmp.lt.s32.totalorder %s3667_s12, %s3667_s12 }
  0x4e   :  { %p3674_p10 = por %p3673_p9, %p3672_p8 }
  0x50   :  { %p3675_p11 = pnand %p3674_p10, %p3668_p7 }
  0x52   :  { %3678 = shalt.err (!%p3675_p11)
}
  0x53   :  { %82 = dma.hbm_to_vmem [thread:$0]  %s4785_s6, 6144, %s77_s24, [#allocation10], %s3711_s25, %s3711_s25, %s3712_s26  }
  0x54   :  { %3701 = dma.done.wait [#allocation4], 2048  }
  0x55   :  { %3702 = vsyncadd [#allocation4], 4294965248 }
  0x56   :  { %3703 = dma.done.wait [#allocation7], 8192  }
  0x57   :  { %3704 = vsyncadd [#allocation7], 4294959104 }
  0x58   :  { %3705 = dma.done.wait [#allocation10], 12288  }
  0x59   :  { %3706 = vsyncadd [#allocation10], 4294955008  ;;  %v3716_v0 = vmov 0   ;;  %v216_v1 = vld [vmem:[#allocation6] sm:$0xff]  ;;  %v217_v2 = vld [vmem:[#allocation6 + $0x8] sm:$0xff] }
  0x5a   :  { %3560 = vset.pattern.permute.xlu0 %v3716_v0  ;;  %3561 = vset.pattern.permute.xlu1 %v3716_v0  ;;  %v3862_v3 = vld [vmem:[#allocation3] sm:$0xff]  ;;  %v3231_v4 = vpack.c.bf16 %v217_v2, %v216_v1  ;;  %v3864_v5 = vld [vmem:[#allocation3 + $0x8] sm:$0xff]  ;;  %v218_v6 = vld [vmem:[#allocation6 + $0x10] sm:$0xff] }
  0x5b   :  { %v219_v7 = vld [vmem:[#allocation6 + $0x18] sm:$0xff]  ;;  %v3263_v8 = vpack.c.bf16 %v3864_v5, %v3862_v3  ;;  %v3868_v10 = vld [vmem:[#allocation3 + $0x10] sm:$0xff]  ;;  %v220_v12 = vld [vmem:[#allocation6 + $0x20] sm:$0xff] }
  0x5c   :  { %v3235_v9 = vpack.c.bf16 %v219_v7, %v218_v6  ;;  %v3870_v11 = vld [vmem:[#allocation3 + $0x18] sm:$0xff]  ;;  %3232 = vmatprep.subr.bf16.mxu0 %v3231_v4  ;;  %v221_v14 = vld [vmem:[#allocation6 + $0x28] sm:$0xff]  ;;  %v3874_v15 = vld [vmem:[#allocation3 + $0x20] sm:$0xff] }
  0x5d   :  { %v3267_v13 = vpack.c.bf16 %v3870_v11, %v3868_v10  ;;  %v3876_v16 = vld [vmem:[#allocation3 + $0x28] sm:$0xff]  ;;  %3264 = vmatprep.subr.bf16.mxu1 %v3263_v8  ;;  %3234 = vmatpush3.bf16.msra.mxu0 %v3231_v4  ;;  %v3239_v17 = vpack.c.bf16 %v221_v14, %v220_v12  ;;  %v222_v19 = vld [vmem:[#allocation6 + $0x30] sm:$0xff]  ;;  %v223_v20 = vld [vmem:[#allocation6 + $0x38] sm:$0xff] }
  0x5e   :  { %3266 = vmatpush3.bf16.msra.mxu1 %v3263_v8  ;;  %3236 = vmatprep.subr.bf16.mxu0 %v3235_v9  ;;  %v3271_v18 = vpack.c.bf16 %v3876_v16, %v3874_v15  ;;  %v3880_v21 = vld [vmem:[#allocation3 + $0x30] sm:$0xff]  ;;  %v3882_v22 = vld [vmem:[#allocation3 + $0x38] sm:$0xff]  ;;  %v3243_v23 = vpack.c.bf16 %v223_v20, %v222_v19  ;;  %v224_v25 = vld [vmem:[#allocation6 + $0x40] sm:$0xff] }
  0x5f   :  { %3268 = vmatprep.subr.bf16.mxu1 %v3267_v13  ;;  %v3275_v24 = vpack.c.bf16 %v3882_v22, %v3880_v21  ;;  %v225_v26 = vld [vmem:[#allocation6 + $0x48] sm:$0xff]  ;;  %v3889_v27 = vld [vmem:[%s4779_s0] sm:$0xff]  ;;  %v226_v32 = vld [vmem:[#allocation6 + $0x50] sm:$0xff] }
  0x60   :  { %v3891_v28 = vld [vmem:[#allocation3 + $0x40] sm:$0xff]  ;;  %v3893_v29 = vld [vmem:[#allocation3 + $0x48] sm:$0xff]  ;;  %2871 = vmatprep.mubr.f32.mxu0 %v3889_v27  ;;  %2927 = vmatprep.mubr.f32.mxu1 %v3889_v27  ;;  %v3247_v30 = vpack.c.bf16 %v225_v26, %v224_v25  ;;  %v227_v33 = vld [vmem:[#allocation6 + $0x58] sm:$0xff] }
  0x61   :  { %3238 = vmatpush3.bf16.msra.mxu0 %v3235_v9  ;;  %v3279_v31 = vpack.c.bf16 %v3893_v29, %v3891_v28  ;;  %v3899_v34 = vld [vmem:[#allocation3 + $0x50] sm:$0xff]  ;;  %v3901_v35 = vld [vmem:[#allocation3 + $0x58] sm:$0xff]  ;;  %v3906_v36 = vld [vmem:[%s4780_s1] sm:$0xff]  ;;  %v3251_v38 = vpack.c.bf16 %v227_v33, %v226_v32 }
  0x62   :  { %3270 = vmatpush3.bf16.msra.mxu1 %v3267_v13  ;;  %3240 = vmatprep.subr.bf16.mxu0 %v3239_v17  ;;  %v3912_v37 = vld [vmem:[%s4780_s1 + $0x10] sm:$0xff]  ;;  %v3917_v39 = vld [vmem:[%s4780_s1 + $0x8] sm:$0xff]  ;;  %v3283_v40 = vpack.c.bf16 %v3901_v35, %v3899_v34  ;;  %v228_v41 = vld [vmem:[#allocation6 + $0x60] sm:$0xff] }
  0x63   :  { %3272 = vmatprep.subr.bf16.mxu1 %v3271_v18  ;;  %138 = vperm.xlu0 %3560, %v3906_v36   ;;  %v229_v42 = vld [vmem:[#allocation6 + $0x68] sm:$0xff]  ;;  %v3922_v43 = vld [vmem:[#allocation3 + $0x60] sm:$0xff]  ;;  %v3929_v45 = vld [vmem:[%s4780_s1 + $0x18] sm:$0xff] }
  0x64   :  { %148 = vperm.xlu1 %3561, %v3912_v37   ;;  %v3924_v44 = vld [vmem:[#allocation3 + $0x68] sm:$0xff]  ;;  %v3255_v46 = vpack.c.bf16 %v229_v42, %v228_v41  ;;  %v3935_v47 = vld [vmem:[%s4780_s1 + $0x20] sm:$0xff]  ;;  %v230_v49 = vld [vmem:[#allocation6 + $0x70] sm:$0xff] }
  0x65   :  { %3242 = vmatpush3.bf16.msra.mxu0 %v3239_v17  ;;  %v3287_v48 = vpack.c.bf16 %v3924_v44, %v3922_v43  ;;  %v231_v50 = vld [vmem:[#allocation6 + $0x78] sm:$0xff]  ;;  %v3940_v51 = vld [vmem:[#allocation3 + $0x70] sm:$0xff]  ;;  %v3947_v53 = vld [vmem:[%s4780_s1 + $0x28] sm:$0xff] }
  0x66   :  { %3274 = vmatpush3.bf16.msra.mxu1 %v3271_v18  ;;  %3244 = vmatprep.subr.bf16.mxu0 %v3243_v23  ;;  %v3942_v52 = vld [vmem:[#allocation3 + $0x78] sm:$0xff]  ;;  %v3259_v54 = vpack.c.bf16 %v231_v50, %v230_v49  ;;  %v3953_v55 = vld [vmem:[%s4780_s1 + $0x30] sm:$0xff]  ;;  %v3967_v58 = vld [vmem:[%s4780_s1 + $0x40] sm:$0xff] }
  0x67   :  { %3276 = vmatprep.subr.bf16.mxu1 %v3275_v24  ;;  %143 = vperm.xlu0 %3560, %v3917_v39   ;;  %v3291_v56 = vpack.c.bf16 %v3942_v52, %v3940_v51  ;;  %v3961_v57 = vld [vmem:[%s4780_s1 + $0x38] sm:$0xff]  ;;  %v3973_v59 = vld [vmem:[%s4780_s1 + $0x48] sm:$0xff]  ;;  %v106_v61 = vld [vmem:[%s4779_s0 + $0x10] sm:$0xff] }
  0x68   :  { %153 = vperm.xlu1 %3561, %v3929_v45   ;;  %v105_v60 = vld [vmem:[%s4779_s0 + $0x8] sm:$0xff]  ;;  %v3985_v62 = vld [vmem:[%s4780_s1 + $0x50] sm:$0xff]  ;;  %v3991_v63 = vld [vmem:[%s4780_s1 + $0x58] sm:$0xff] }
  0x69   :  { %3246 = vmatpush3.bf16.msra.mxu0 %v3243_v23  ;;  %v107_v0 = vld [vmem:[%s4779_s0 + $0x18] sm:$0xff]  ;;  %v108_v1 = vld [vmem:[%s4779_s0 + $0x20] sm:$0xff]  ;;  %v4009_v4 = vld [vmem:[%s4780_s1 + $0x68] sm:$0xff] }
  0x6a   :  { %3278 = vmatpush3.bf16.msra.mxu1 %v3275_v24  ;;  %3248 = vmatprep.subr.bf16.mxu0 %v3247_v30  ;;  %v4003_v2 = vld [vmem:[%s4780_s1 + $0x60] sm:$0xff]  ;;  %v109_v6 = vld [vmem:[%s4779_s0 + $0x28] sm:$0xff]  ;;  %v110_v7 = vld [vmem:[%s4779_s0 + $0x30] sm:$0xff] }
  0x6b   :  { %3280 = vmatprep.subr.bf16.mxu1 %v3279_v31  ;;  %158 = vperm.xlu0 %3560, %v3935_v47   ;;  %v4021_v8 = vld [vmem:[%s4780_s1 + $0x70] sm:$0xff]  ;;  %v111_v9 = vld [vmem:[%s4779_s0 + $0x38] sm:$0xff]  ;;  %v682_v13 = vld [vmem:[#allocation8 + $0x80] sm:$0xff] }
  0x6c   :  { %163 = vperm.xlu1 %3561, %v3947_v53   ;;  %v4030_v12 = vld [vmem:[%s4780_s1 + $0x78] sm:$0xff]  ;;  %v683_v14 = vld [vmem:[#allocation8 + $0x88] sm:$0xff]  ;;  %v698_v17 = vld [vmem:[#allocation8 + $0x100] sm:$0xff] }
  0x6d   :  { %3250 = vmatpush3.bf16.msra.mxu0 %v3247_v30  ;;  %v4035_v18 = vld [vmem:[%s4779_s0 + $0x40] sm:$0xff]  ;;  %v3295_v19 = vpack.c.bf16 %v683_v14, %v682_v13  ;;  %v699_v20 = vld [vmem:[#allocation8 + $0x108] sm:$0xff]  ;;  %v4049_v30 = vld [vmem:[%s4779_s0 + $0x50] sm:$0xff] }
  0x6e   :  { %3282 = vmatpush3.bf16.msra.mxu1 %v3279_v31  ;;  %3252 = vmatprep.subr.bf16.mxu0 %v3251_v38  ;;  %v3327_v23 = vpack.c.bf16 %v699_v20, %v698_v17  ;;  %v4043_v24 = vld [vmem:[%s4779_s0 + $0x48] sm:$0xff]  ;;  %v666_v25 = vld [vmem:[#allocation8] sm:$0xff]  ;;  %v4057_v32 = vld [vmem:[%s4779_s0 + $0x58] sm:$0xff] }
  0x6f   :  { %3284 = vmatprep.subr.bf16.mxu1 %v3283_v40  ;;  %168 = vperm.xlu0 %3560, %v3953_v55   ;;  %v667_v26 = vld [vmem:[#allocation8 + $0x8] sm:$0xff]  ;;  %v684_v33 = vld [vmem:[#allocation8 + $0x90] sm:$0xff]  ;;  %v701_v41 = vld [vmem:[#allocation8 + $0x118] sm:$0xff] }
  0x70   :  { %173 = vperm.xlu1 %3561, %v3961_v57   ;;  %v3297_v31 = vpack.c.bf16 %v667_v26, %v666_v25  ;;  %v4075_v49 = vld [vmem:[%s4779_s0 + $0x68] sm:$0xff]  ;;  %v705_v13 = vld [vmem:[#allocation8 + $0x138] sm:$0xff]  ;;  %v672_v20 = vld [vmem:[#allocation8 + $0x30] sm:$0xff] }
  0x71   :  { %3254 = vmatpush3.bf16.msra.mxu0 %v3251_v38  ;;  %v685_v38 = vld [vmem:[#allocation8 + $0x98] sm:$0xff]  ;;  %v687_v50 = vld [vmem:[#allocation8 + $0xa8] sm:$0xff]  ;;  %v690_v25 = vld [vmem:[#allocation8 + $0xc0] sm:$0xff] }
  0x72   :  { %3286 = vmatpush3.bf16.msra.mxu1 %v3283_v40  ;;  %3256 = vmatprep.subr.bf16.mxu0 %v3255_v46  ;;  %v700_v40 = vld [vmem:[#allocation8 + $0x110] sm:$0xff]  ;;  %v691_v26 = vld [vmem:[#allocation8 + $0xc8] sm:$0xff] }
  0x73   :  { %3288 = vmatprep.subr.bf16.mxu1 %v3287_v48  ;;  %178 = vperm.xlu0 %3560, %v3967_v58   ;;  %v3331_v42 = vpack.c.bf16 %v701_v41, %v700_v40  ;;  %v674_v40 = vld [vmem:[#allocation8 + $0x40] sm:$0xff]  ;;  %v692_v41 = vld [vmem:[#allocation8 + $0xd0] sm:$0xff] }
  0x74   :  { %183 = vperm.xlu1 %3561, %v3973_v59  }
  0x75   :  { %3258 = vmatpush3.bf16.msra.mxu0 %v3255_v46  ;;  %v668_v46 = vld [vmem:[#allocation8 + $0x10] sm:$0xff] }
  0x76   :  { %3290 = vmatpush3.bf16.msra.mxu1 %v3287_v48  ;;  %3260 = vmatprep.subr.bf16.mxu0 %v3259_v54  ;;  %v669_v48 = vld [vmem:[#allocation8 + $0x18] sm:$0xff] }
  0x77   :  { %3292 = vmatprep.subr.bf16.mxu1 %v3291_v56  ;;  %188 = vperm.xlu0 %3560, %v3985_v62  }
  0x78   :  { %193 = vperm.xlu1 %3561, %v3991_v63  }
  0x79   :  { %3262 = vmatpush3.bf16.msra.mxu0 %v3259_v54  ;;  %v702_v54 = vld [vmem:[#allocation8 + $0x120] sm:$0xff] }
  0x7a   :  { %3294 = vmatpush3.bf16.msra.mxu1 %v3291_v56  ;;  %3296 = vmatprep.subr.bf16.mxu0 %v3295_v19  ;;  %v703_v56 = vld [vmem:[#allocation8 + $0x128] sm:$0xff] }
  0x7b   :  { %198 = vperm.xlu0 %3560, %v4003_v2   ;;  %3328 = vmatprep.subr.bf16.mxu1 %v3327_v23 }
  0x7c   :  { %2872 = vmatmul.mubr.f32.vlgmr.msra.gmra.mrb[0].mxu0 %v105_v60  ;;  %203 = vperm.xlu1 %3561, %v4009_v4  }
  0x7d   :  { %2928 = vmatmul.mubr.f32.vlgmr.msra.gmra.mrb[0].mxu1 %v105_v60  ;;  %2874 = vmatprep.mubr.f32.mxu0 %v106_v61  ;;  %v3301_v60 = vpack.c.bf16 %v669_v48, %v668_v46  ;;  %v708_v46 = vld [vmem:[#allocation8 + $0x150] sm:$0xff]  ;;  %v709_v48 = vld [vmem:[#allocation8 + $0x158] sm:$0xff] }
  0x7e   :  { %2930 = vmatprep.mubr.f32.mxu1 %v106_v61  ;;  %3330 = vmatpush3.bf16.msra.mxu1 %v3327_v23  ;;  %v4089_v61 = vld [vmem:[%s4779_s0 + $0x78] sm:$0xff] }
  0x7f   :  { %208 = vperm.xlu0 %3560, %v4021_v8   ;;  %3298 = vmatpush3.bf16.msra.mxu0 %v3297_v31  ;;  %v673_v23 = vld [vmem:[#allocation8 + $0x38] sm:$0xff]  ;;  %v706_v31 = vld [vmem:[#allocation8 + $0x140] sm:$0xff] }
  0x80   :  { %2875 = vmatmul.mubr.f32.gmra.mrb[2].mxu0 %v107_v0  ;;  %213 = vperm.xlu1 %3561, %v4030_v12  }
  0x81   :  { %2931 = vmatmul.mubr.f32.gmra.mrb[2].mxu1 %v107_v0  ;;  %2877 = vmatprep.mubr.f32.mxu0 %v108_v1 }
  0x82   :  { %2933 = vmatprep.mubr.f32.mxu1 %v108_v1  ;;  %3332 = vmatprep.subr.bf16.mxu1 %v3331_v42  ;;  %v670_v1 = vld [vmem:[#allocation8 + $0x20] sm:$0xff] }
  0x83   :  { %1827 = vperm.xlu0 %3560, %v3906_v36   ;;  %v4065_v36 = vld [vmem:[%s4779_s0 + $0x60] sm:$0xff]  ;;  %3334 = vmatpush3.bf16.msra.mxu1 %v3331_v42  ;;  %v693_v42 = vld [vmem:[#allocation8 + $0xd8] sm:$0xff] }
  0x84   :  { %2878 = vmatmul.mubr.f32.gmra.mrb[4].mxu0 %v109_v6  ;;  %1832 = vperm.xlu1 %3561, %v3917_v39   ;;  %v3299_v39 = vpack.c.bf16 %v685_v38, %v684_v33  ;;  %v3311_v33 = vpack.c.bf16 %v691_v26, %v690_v25 }
  0x85   :  { %2934 = vmatmul.mubr.f32.gmra.mrb[4].mxu1 %v109_v6  ;;  %2880 = vmatprep.mubr.f32.mxu0 %v110_v7  ;;  %v671_v6 = vld [vmem:[#allocation8 + $0x28] sm:$0xff] }
  0x86   :  { %2936 = vmatprep.mubr.f32.mxu1 %v110_v7  ;;  %3300 = vmatprep.subr.bf16.mxu0 %v3299_v39  ;;  %v688_v7 = vld [vmem:[#allocation8 + $0xb0] sm:$0xff]  ;;  %v3305_v14 = vpack.c.bf16 %v671_v6, %v670_v1  ;;  %v675_v39 = vld [vmem:[#allocation8 + $0x48] sm:$0xff] }
  0x87   :  { %1837 = vperm.xlu0 %3560, %v3912_v37   ;;  %v686_v37 = vld [vmem:[#allocation8 + $0xa0] sm:$0xff]  ;;  %3302 = vmatpush3.bf16.msra.mxu0 %v3301_v60  ;;  %v695_v60 = vld [vmem:[#allocation8 + $0xe8] sm:$0xff] }
  0x88   :  { %2881 = vmatmul.mubr.f32.gmra.mrb[6].mxu0 %v111_v9  ;;  %1842 = vperm.xlu1 %3561, %v3929_v45   ;;  %v4081_v45 = vld [vmem:[%s4779_s0 + $0x70] sm:$0xff]  ;;  %v3303_v0 = vpack.c.bf16 %v687_v50, %v686_v37  ;;  %v3347_v37 = vpack.c.bf16 %v709_v48, %v708_v46  ;;  %v711_v1 = vld [vmem:[#allocation8 + $0x168] sm:$0xff] }
  0x89   :  { %2937 = vmatmul.mubr.f32.gmra.mrb[6].mxu1 %v111_v9  ;;  %2883 = vmatprep.mubr.f32.mxu0 %v4035_v18  ;;  %v704_v9 = vld [vmem:[#allocation8 + $0x130] sm:$0xff] }
  0x8a   :  { %2939 = vmatprep.mubr.f32.mxu1 %v4035_v18  ;;  %3304 = vmatprep.subr.bf16.mxu0 %v3303_v0  ;;  %v3339_v19 = vpack.c.bf16 %v705_v13, %v704_v9  ;;  %v676_v50 = vld [vmem:[#allocation8 + $0x50] sm:$0xff]  ;;  %v710_v0 = vld [vmem:[#allocation8 + $0x160] sm:$0xff] }
  0x8b   :  { %1847 = vperm.xlu0 %3560, %v3935_v47   ;;  %v3335_v47 = vpack.c.bf16 %v703_v56, %v702_v54  ;;  %3306 = vmatpush3.bf16.msra.mxu0 %v3305_v14  ;;  %v677_v54 = vld [vmem:[#allocation8 + $0x58] sm:$0xff]  ;;  %v694_v56 = vld [vmem:[#allocation8 + $0xe0] sm:$0xff]  ;;  %v3351_v6 = vpack.c.bf16 %v711_v1, %v710_v0  ;;  %v712_v9 = vld [vmem:[#allocation8 + $0x170] sm:$0xff] }
  0x8c   :  { %2884 = vmatmul.mubr.f32.gmra.mrb[8].mxu0 %v4043_v24  ;;  %1852 = vperm.xlu1 %3561, %v3947_v53   ;;  %v689_v53 = vld [vmem:[#allocation8 + $0xb8] sm:$0xff] }
  0x8d   :  { %2940 = vmatmul.mubr.f32.gmra.mrb[8].mxu1 %v4043_v24  ;;  %2886 = vmatprep.mubr.f32.mxu0 %v4049_v30  ;;  %v3307_v17 = vpack.c.bf16 %v689_v53, %v688_v7  ;;  %v679_v7 = vld [vmem:[#allocation8 + $0x68] sm:$0xff]  ;;  %v713_v14 = vld [vmem:[#allocation8 + $0x178] sm:$0xff] }
  0x8e   :  { %2942 = vmatprep.mubr.f32.mxu1 %v4049_v30  ;;  %3336 = vmatprep.subr.bf16.mxu1 %v3335_v47 }
  0x8f   :  { %1857 = vperm.xlu0 %3560, %v3953_v55   ;;  %3338 = vmatpush3.bf16.msra.mxu1 %v3335_v47  ;;  %v707_v55 = vld [vmem:[#allocation8 + $0x148] sm:$0xff]  ;;  %v678_v47 = vld [vmem:[#allocation8 + $0x60] sm:$0xff] }
  0x90   :  { %2887 = vmatmul.mubr.f32.gmra.mrb[10].mxu0 %v4057_v32  ;;  %1862 = vperm.xlu1 %3561, %v3961_v57   ;;  %v3309_v57 = vpack.c.bf16 %v673_v23, %v672_v20  ;;  %v3343_v38 = vpack.c.bf16 %v707_v55, %v706_v31  ;;  %v3321_v53 = vpack.c.bf16 %v679_v7, %v678_v47 }
  0x91   :  { %2943 = vmatmul.mubr.f32.gmra.mrb[10].mxu1 %v4057_v32  ;;  %2889 = vmatprep.mubr.f32.mxu0 %v4065_v36  ;;  %v3355_v20 = vpack.c.bf16 %v713_v14, %v712_v9 }
  0x92   :  { %2945 = vmatprep.mubr.f32.mxu1 %v4065_v36  ;;  %3308 = vmatprep.subr.bf16.mxu0 %v3307_v17  ;;  %v680_v17 = vld [vmem:[#allocation8 + $0x70] sm:$0xff] }
  0x93   :  { %1867 = vperm.xlu0 %3560, %v3967_v58   ;;  %3340 = vmatprep.subr.bf16.mxu1 %v3339_v19  ;;  %v3313_v58 = vpack.c.bf16 %v675_v39, %v674_v40 }
  0x94   :  { %2890 = vmatmul.mubr.f32.gmra.mrb[12].mxu0 %v4075_v49  ;;  %1872 = vperm.xlu1 %3561, %v3973_v59   ;;  %v3315_v59 = vpack.c.bf16 %v693_v42, %v692_v41 }
  0x95   :  { %2946 = vmatmul.mubr.f32.gmra.mrb[12].mxu1 %v4075_v49  ;;  %2892 = vmatprep.mubr.f32.mxu0 %v4081_v45 }
  0x96   :  { %2948 = vmatprep.mubr.f32.mxu1 %v4081_v45  ;;  %3342 = vmatpush3.bf16.msra.mxu1 %v3339_v19  ;;  %v681_v19 = vld [vmem:[#allocation8 + $0x78] sm:$0xff] }
  0x97   :  { %1877 = vperm.xlu0 %3560, %v3985_v62   ;;  %3310 = vmatpush3.bf16.msra.mxu0 %v3309_v57  ;;  %v3317_v62 = vpack.c.bf16 %v677_v54, %v676_v50  ;;  %v3325_v23 = vpack.c.bf16 %v681_v19, %v680_v17 }
  0x98   :  { %2893 = vmatmul.mubr.f32.gmra.mrb[14].mxu0 %v4089_v61  ;;  %1882 = vperm.xlu1 %3561, %v3991_v63   ;;  %v3319_v63 = vpack.c.bf16 %v695_v60, %v694_v56 }
  0x99   :  { %2949 = vmatmul.mubr.f32.gmra.mrb[14].mxu1 %v4089_v61  ;;  %3312 = vmatprep.subr.bf16.mxu0 %v3311_v33 }
  0x9a   :  { %3344 = vmatprep.subr.bf16.mxu1 %v3343_v38 }
  0x9b   :  { %1887 = vperm.xlu0 %3560, %v4003_v2   ;;  %3346 = vmatpush3.bf16.msra.mxu1 %v3343_v38  ;;  %v696_v2 = vld [vmem:[#allocation8 + $0xf0] sm:$0xff] }
  0x9c   :  { %1892 = vperm.xlu1 %3561, %v4009_v4   ;;  %3314 = vmatpush3.bf16.msra.mxu0 %v3313_v58  ;;  %v697_v4 = vld [vmem:[#allocation8 + $0xf8] sm:$0xff] }
  0x9d   :  { %3316 = vmatprep.subr.bf16.mxu0 %v3315_v59  ;;  %3348 = vmatprep.subr.bf16.mxu1 %v3347_v37  ;;  %v3323_v13 = vpack.c.bf16 %v697_v4, %v696_v2 }
  0x9f   :  { %1897 = vperm.xlu0 %3560, %v4021_v8   ;;  %3350 = vmatpush3.bf16.msra.mxu1 %v3347_v37 }
  0xa0   :  { %1902 = vperm.xlu1 %3561, %v4030_v12   ;;  %3318 = vmatpush3.bf16.msra.mxu0 %v3317_v62 }
  0xa1   :  { %3320 = vmatprep.subr.bf16.mxu0 %v3319_v63  ;;  %3352 = vmatprep.subr.bf16.mxu1 %v3351_v6 }
  0xa3   :  { %3354 = vmatpush3.bf16.msra.mxu1 %v3351_v6 }
  0xa4   :  { %3322 = vmatpush3.bf16.msra.mxu0 %v3321_v53  ;;  %3356 = vmatprep.subr.bf16.mxu1 %v3355_v20 }
  0xa5   :  { %3324 = vmatprep.subr.bf16.mxu0 %v3323_v13 }
  0xa7   :  { %3358 = vmatpush3.bf16.msra.mxu1 %v3355_v20 }
  0xa8   :  { %3326 = vmatpush3.bf16.msra.mxu0 %v3325_v23 }
  0xe2   :  { %v4106_v8 = vpop.permute.xlu0 %138 }
  0xe3   :  { %v4108_v12 = vpop.permute.xlu1 %148 }
  0xe6   :  { %v4110_v25 = vpop.permute.xlu0 %143 }
  0xe7   :  { %v4112_v26 = vpop.permute.xlu1 %153 }
  0xea   :  { %v4114_v31 = vpop.permute.xlu0 %158 }
  0xeb   :  { %4810 = vst [vmem:[#allocation17_spill] sm:$0xff] %v4114_v31  ;;  %v4116_v55 = vpop.permute.xlu1 %163 }
  0xec   :  { %4811 = vst [vmem:[#allocation18_spill] sm:$0xff] %v4116_v55 }
  0xee   :  { %v4125_v46 = vpop.permute.xlu0 %168 }
  0xef   :  { %4812 = vst [vmem:[#allocation19_spill] sm:$0xff] %v4125_v46  ;;  %v4133_v54 = vpop.permute.xlu1 %173 }
  0xf0   :  { %4813 = vst [vmem:[#allocation20_spill] sm:$0xff] %v4133_v54 }
  0xf2   :  { %v4145_v47 = vpop.permute.xlu0 %178 }
  0xf3   :  { %4814 = vst [vmem:[#allocation21_spill] sm:$0xff] %v4145_v47  ;;  %v4151_v53 = vpop.permute.xlu1 %183 }
  0xf4   :  { %4815 = vst [vmem:[#allocation22_spill] sm:$0xff] %v4151_v53 }
  0xf6   :  { %v4163_v19 = vpop.permute.xlu0 %188 }
  0xf7   :  { %4816 = vst [vmem:[#allocation23_spill] sm:$0xff] %v4163_v19 }
 0x14f   :  { %v2873_v57 = vpop.f32.mrb[0].mxu0 }
 0x150   :  { %v4119_v33 = vmul.f32 %v2873_v57, %v4110_v25  ;;  %v2929_v38 = vpop.f32.mrb[0].mxu1  ;;  %v298_v40 = vpop.f32.mrb[1].mxu0 }
 0x151   :  { %v4122_v39 = vmul.f32 %v298_v40, %v4106_v8  ;;  %v507_v41 = vpop.f32.mrb[1].mxu1  ;;  %v587_v58 = vmul.f32 %v2929_v38, %v4110_v25  ;;  %v4168_v40 = vpop.permute.xlu1 %193 }
 0x152   :  { %v586_v42 = vmul.f32 %v507_v41, %v4106_v8  ;;  %4817 = vst [vmem:[#allocation24_spill] sm:$0xff] %v4168_v40 }
 0x153   :  { %v2876_v48 = vpop.f32.mrb[2].mxu0  ;;  %2983 = vmatprep.mubr.f32.mxu1 %v4122_v39 }
 0x154   :  { %v4130_v59 = vmul.f32 %v2876_v48, %v4112_v26  ;;  %785 = vmatprep.mubr.f32.mxu0 %v586_v42  ;;  %v308_v37 = vpop.f32.mrb[3].mxu0  ;;  %2984 = vmatmul.mubr.f32.vlgmr.msra.gmra.mrb[16].mxu1 %v4119_v33  ;;  %v2932_v50 = vpop.f32.mrb[2].mxu1 }
 0x155   :  { %v4136_v56 = vmul.f32 %v308_v37, %v4108_v12  ;;  %786 = vmatmul.mubr.f32.vlgmr.msra.gmra.mrb[16].mxu0 %v3862_v3  ;;  %v517_v60 = vpop.f32.mrb[3].mxu1  ;;  %v589_v4 = vmul.f32 %v2932_v50, %v4112_v26 }
 0x156   :  { %790 = vmatprep.mubr.f32.mxu0 %v587_v58  ;;  %v588_v0 = vmul.f32 %v517_v60, %v4108_v12  ;;  %v4180_v60 = vpop.permute.xlu0 %198 }
 0x157   :  { %v2879_v1 = vpop.f32.mrb[4].mxu0  ;;  %2986 = vmatprep.mubr.f32.mxu1 %v4136_v56  ;;  %4818 = vst [vmem:[#allocation25_spill] sm:$0xff] %v4180_v60 }
 0x158   :  { %v4142_v62 = vmul.f32 %v2879_v1, %v4116_v55  ;;  %v2935_v63 = vpop.f32.mrb[4].mxu1  ;;  %v318_v6 = vpop.f32.mrb[5].mxu0  ;;  %2987 = vmatmul.mubr.f32.gmra.mrb[18].mxu1 %v4130_v59 }
 0x159   :  { %v4148_v7 = vmul.f32 %v318_v6, %v4114_v31  ;;  %v527_v3 = vpop.f32.mrb[5].mxu1  ;;  %791 = vmatmul.mubr.f32.gmra.mrb[18].mxu0 %v3864_v5  ;;  %v591_v58 = vmul.f32 %v2935_v63, %v4116_v55  ;;  %v4189_v6 = vpop.permute.xlu1 %203 }
 0x15a   :  { %795 = vmatprep.mubr.f32.mxu0 %v588_v0  ;;  %v590_v23 = vmul.f32 %v527_v3, %v4114_v31  ;;  %4819 = vst [vmem:[#allocation26_spill] sm:$0xff] %v4189_v6  ;;  %v1299_v31 = vld [vmem:[#allocation9 + $0xf8] sm:$0xff] }
 0x15b   :  { %v2882_v2 = vpop.f32.mrb[6].mxu0  ;;  %2989 = vmatprep.mubr.f32.mxu1 %v4148_v7 }
 0x15c   :  { %v2938_v9 = vpop.f32.mrb[6].mxu1  ;;  %v328_v13 = vpop.f32.mrb[7].mxu0  ;;  %2990 = vmatmul.mubr.f32.gmra.mrb[20].mxu1 %v4142_v62  ;;  %v4161_v5 = vmul.f32 %v2882_v2, %v4133_v54 }
 0x15d   :  { %v4157_v14 = vmul.f32 %v328_v13, %v4125_v46  ;;  %v537_v17 = vpop.f32.mrb[7].mxu1  ;;  %796 = vmatmul.mubr.f32.gmra.mrb[20].mxu0 %v3868_v10 }
 0x15e   :  { %800 = vmatprep.mubr.f32.mxu0 %v589_v4  ;;  %v592_v63 = vmul.f32 %v537_v17, %v4125_v46  ;;  %v593_v17 = vmul.f32 %v2938_v9, %v4133_v54  ;;  %v1295_v54 = vld [vmem:[#allocation9 + $0xd8] sm:$0xff] }
 0x15f   :  { %v2885_v20 = vpop.f32.mrb[8].mxu0  ;;  %2992 = vmatprep.mubr.f32.mxu1 %v4157_v14 }
 0x160   :  { %v2941_v57 = vpop.f32.mrb[8].mxu1  ;;  %v338_v38 = vpop.f32.mrb[9].mxu0  ;;  %2993 = vmatmul.mubr.f32.gmra.mrb[22].mxu1 %v4161_v5  ;;  %v4175_v42 = vmul.f32 %v2885_v20, %v4151_v53 }
 0x161   :  { %v4171_v41 = vmul.f32 %v338_v38, %v4145_v47  ;;  %v547_v10 = vpop.f32.mrb[9].mxu1  ;;  %801 = vmatmul.mubr.f32.gmra.mrb[22].mxu0 %v3870_v11 }
 0x162   :  { %805 = vmatprep.mubr.f32.mxu0 %v590_v23  ;;  %v4201_v23 = vpop.permute.xlu0 %208  ;;  %v594_v9 = vmul.f32 %v547_v10, %v4145_v47 }
 0x163   :  { %v2888_v48 = vpop.f32.mrb[10].mxu0  ;;  %2995 = vmatprep.mubr.f32.mxu1 %v4171_v41  ;;  %4820 = vst [vmem:[#allocation27_spill] sm:$0xff] %v4201_v23 }
 0x164   :  { %v2944_v37 = vpop.f32.mrb[10].mxu1  ;;  %v348_v50 = vpop.f32.mrb[11].mxu0  ;;  %2996 = vmatmul.mubr.f32.gmra.mrb[24].mxu1 %v4175_v42  ;;  %v4187_v11 = vmul.f32 %v2888_v48, %v4168_v40 }
 0x165   :  { %v4183_v0 = vmul.f32 %v348_v50, %v4163_v19  ;;  %v557_v1 = vpop.f32.mrb[11].mxu1  ;;  %806 = vmatmul.mubr.f32.gmra.mrb[24].mxu0 %v3874_v15  ;;  %v4206_v50 = vpop.permute.xlu1 %213 }
 0x166   :  { %810 = vmatprep.mubr.f32.mxu0 %v591_v58  ;;  %4821 = vst [vmem:[#allocation28_spill] sm:$0xff] %v4206_v50 }
 0x167   :  { %v2891_v3 = vpop.f32.mrb[12].mxu0  ;;  %2998 = vmatprep.mubr.f32.mxu1 %v4183_v0 }
 0x168   :  { %v2947_v2 = vpop.f32.mrb[12].mxu1  ;;  %v358_v4 = vpop.f32.mrb[13].mxu0  ;;  %2999 = vmatmul.mubr.f32.gmra.mrb[26].mxu1 %v4187_v11  ;;  %v4199_v15 = vmul.f32 %v2891_v3, %v4189_v6 }
 0x169   :  { %v4195_v13 = vmul.f32 %v358_v4, %v4180_v60  ;;  %v567_v20 = vpop.f32.mrb[13].mxu1  ;;  %811 = vmatmul.mubr.f32.gmra.mrb[26].mxu0 %v3876_v16 }
 0x16a   :  { %815 = vmatprep.mubr.f32.mxu0 %v592_v63  ;;  %v595_v63 = vmul.f32 %v2941_v57, %v4151_v53 }
 0x16b   :  { %v2894_v38 = vpop.f32.mrb[14].mxu0  ;;  %3001 = vmatprep.mubr.f32.mxu1 %v4195_v13 }
 0x16c   :  { %v2950_v48 = vpop.f32.mrb[14].mxu1  ;;  %v368_v58 = vpop.f32.mrb[15].mxu0  ;;  %3002 = vmatmul.mubr.f32.gmra.mrb[28].mxu1 %v4199_v15  ;;  %v4213_v3 = vmul.f32 %v2894_v38, %v4206_v50  ;;  %v597_v38 = vmul.f32 %v2944_v37, %v4168_v40 }
 0x16d   :  { %v4209_v4 = vmul.f32 %v368_v58, %v4201_v23  ;;  %v577_v16 = vpop.f32.mrb[15].mxu1  ;;  %816 = vmatmul.mubr.f32.gmra.mrb[28].mxu0 %v3880_v21  ;;  %v596_v21 = vmul.f32 %v557_v1, %v4163_v19 }
 0x16e   :  { %820 = vmatprep.mubr.f32.mxu0 %v593_v17 }
 0x16f   :  { %3004 = vmatprep.mubr.f32.mxu1 %v4209_v4 }
 0x170   :  { %3005 = vmatmul.mubr.f32.gmra.mrb[30].mxu1 %v4213_v3 }
 0x171   :  { %821 = vmatmul.mubr.f32.gmra.mrb[30].mxu0 %v3882_v22  ;;  %3039 = vmatprep.mubr.f32.mxu1 %v3889_v27  ;;  %v598_v22 = vmul.f32 %v567_v20, %v4180_v60  ;;  %v599_v27 = vmul.f32 %v2947_v2, %v4189_v6 }
 0x172   :  { %825 = vmatprep.mubr.f32.mxu0 %v594_v9 }
 0x175   :  { %826 = vmatmul.mubr.f32.gmra.mrb[32].mxu0 %v3891_v28  ;;  %v600_v28 = vmul.f32 %v577_v16, %v4201_v23  ;;  %v1289_v23 = vld [vmem:[#allocation9 + $0xa8] sm:$0xff] }
 0x176   :  { %830 = vmatprep.mubr.f32.mxu0 %v595_v63  ;;  %v1284_v63 = vld [vmem:[#allocation9 + $0x80] sm:$0xff] }
 0x179   :  { %831 = vmatmul.mubr.f32.gmra.mrb[34].mxu0 %v3893_v29  ;;  %v601_v29 = vmul.f32 %v2950_v48, %v4206_v50  ;;  %v1288_v50 = vld [vmem:[#allocation9 + $0xa0] sm:$0xff] }
 0x17a   :  { %835 = vmatprep.mubr.f32.mxu0 %v596_v21  ;;  %v1285_v21 = vld [vmem:[#allocation9 + $0x88] sm:$0xff] }
 0x17d   :  { %836 = vmatmul.mubr.f32.gmra.mrb[36].mxu0 %v3899_v34 }
 0x17e   :  { %840 = vmatprep.mubr.f32.mxu0 %v597_v38  ;;  %v1268_v38 = vld [vmem:[#allocation9] sm:$0xff] }
 0x181   :  { %841 = vmatmul.mubr.f32.gmra.mrb[38].mxu0 %v3901_v35 }
 0x182   :  { %845 = vmatprep.mubr.f32.mxu0 %v598_v22 }
 0x185   :  { %846 = vmatmul.mubr.f32.gmra.mrb[40].mxu0 %v3922_v43  ;;  %v4238_v43 = vld [vmem:[%s4786_s7] ss:$0 sm:$0xff] }
 0x186   :  { %850 = vmatprep.mubr.f32.mxu0 %v599_v27  ;;  %v3391_v27 = vpack.c.bf16 %v1285_v21, %v1284_v63 }
 0x188   :  { %3392 = vmatprep.subr.bf16.mxu0 %v3391_v27 }
 0x189   :  { %851 = vmatmul.mubr.f32.gmra.mrb[42].mxu0 %v3924_v44 }
 0x18a   :  { %855 = vmatprep.mubr.f32.mxu0 %v600_v28  ;;  %v1269_v28 = vld [vmem:[#allocation9 + $0x8] sm:$0xff] }
 0x18d   :  { %856 = vmatmul.mubr.f32.gmra.mrb[44].mxu0 %v3940_v51 }
 0x18e   :  { %860 = vmatprep.mubr.f32.mxu0 %v601_v29  ;;  %v1286_v29 = vld [vmem:[#allocation9 + $0x90] sm:$0xff] }
 0x191   :  { %861 = vmatmul.mubr.f32.gmra.mrb[46].mxu0 %v3942_v52 }
 0x227   :  { %v2985_v34 = vpop.f32.mrb[16].mxu1 }
 0x228   :  { %v2471_v35 = vpop.f32.mrb[16].mxu0  ;;  %v932_v57 = vpop.f32.mrb[17].mxu1 }
 0x229   :  { %v2472_v10 = vpop.f32.mrb[17].mxu0 }
 0x22a   :  { %v2473_v37 = vadd.f32 %v2472_v10, %v2471_v35  ;;  %v1287_v35 = vld [vmem:[#allocation9 + $0x98] sm:$0xff] }
 0x22b   :  { %v2988_v1 = vpop.f32.mrb[18].mxu1 }
 0x22c   :  { %v788_v44 = vadd.f32 %v2473_v37, %v4238_v43  ;;  %v2474_v2 = vpop.f32.mrb[18].mxu0  ;;  %v942_v20 = vpop.f32.mrb[19].mxu1  ;;  %v3393_v37 = vpack.c.bf16 %v1269_v28, %v1268_v38  ;;  %v1272_v38 = vld [vmem:[#allocation9 + $0x20] sm:$0xff] }
 0x22d   :  { %v2475_v17 = vpop.f32.mrb[19].mxu0 }
 0x22e   :  { %v4241_v51 = vadd.f32 %v932_v57, %v788_v44  ;;  %v2476_v48 = vadd.f32 %v2475_v17, %v2474_v2  ;;  %v3395_v44 = vpack.c.bf16 %v1287_v35, %v1286_v29  ;;  %v1270_v2 = vld [vmem:[#allocation9 + $0x10] sm:$0xff]  ;;  %v1271_v17 = vld [vmem:[#allocation9 + $0x18] sm:$0xff]  ;;  %3394 = vmatpush3.bf16.msra.mxu0 %v3393_v37 }
 0x22f   :  { %v4243_v52 = vpop.f32.mrb[20].mxu1  ;;  %v1290_v35 = vld [vmem:[#allocation9 + $0xb0] sm:$0xff] }
 0x230   :  { %v793_v58 = vadd.f32 %v2476_v48, %v4238_v43  ;;  %v2477_v16 = vpop.f32.mrb[20].mxu0  ;;  %v4246_v9 = vpop.f32.mrb[21].mxu1  ;;  %v4797_v6 = vmax.f32 %v4241_v51, 0.0  ;;  %3396 = vmatprep.subr.bf16.mxu0 %v3395_v44 }
 0x231   :  { %v2478_v22 = vpop.f32.mrb[21].mxu0 }
 0x232   :  { %v4248_v10 = vadd.f32 %v2985_v34, %v793_v58  ;;  %v2479_v57 = vadd.f32 %v2478_v22, %v2477_v16  ;;  %v3397_v34 = vpack.c.bf16 %v1271_v17, %v1270_v2  ;;  %v3399_v16 = vpack.c.bf16 %v1289_v23, %v1288_v50  ;;  %v1273_v22 = vld [vmem:[#allocation9 + $0x28] sm:$0xff]  ;;  %v1274_v17 = vld [vmem:[#allocation9 + $0x30] sm:$0xff] }
 0x233   :  { %v4250_v48 = vpop.f32.mrb[22].mxu1  ;;  %v3401_v23 = vpack.c.bf16 %v1273_v22, %v1272_v38 }
 0x234   :  { %v4796_v60 = vmax.f32 %v4248_v10, 0.0  ;;  %v798_v63 = vadd.f32 %v2479_v57, %v4238_v43  ;;  %v2480_v21 = vpop.f32.mrb[22].mxu0  ;;  %v4255_v40 = vpop.f32.mrb[23].mxu1  ;;  %v1291_v57 = vld [vmem:[#allocation9 + $0xb8] sm:$0xff]  ;;  %3398 = vmatpush3.bf16.msra.mxu0 %v3397_v34 }
 0x235   :  { %v2481_v58 = vpop.f32.mrb[23].mxu0  ;;  %3400 = vmatprep.subr.bf16.mxu0 %v3399_v16 }
 0x236   :  { %v4257_v28 = vadd.f32 %v942_v20, %v798_v63  ;;  %v2482_v27 = vadd.f32 %v2481_v58, %v2480_v21  ;;  %v3359_v29 = vpack.c.bf16 %v4796_v60, %v4797_v6  ;;  %v3403_v20 = vpack.c.bf16 %v1291_v57, %v1290_v35  ;;  %v1275_v63 = vld [vmem:[#allocation9 + $0x38] sm:$0xff]  ;;  %v1292_v60 = vld [vmem:[#allocation9 + $0xc0] sm:$0xff]  ;;  %v1293_v6 = vld [vmem:[#allocation9 + $0xc8] sm:$0xff] }
 0x237   :  { %v4263_v19 = vpop.f32.mrb[24].mxu1  ;;  %v3405_v16 = vpack.c.bf16 %v1275_v63, %v1274_v17  ;;  %v1276_v35 = vld [vmem:[#allocation9 + $0x40] sm:$0xff]  ;;  %v1277_v57 = vld [vmem:[#allocation9 + $0x48] sm:$0xff]  ;;  %v1278_v63 = vld [vmem:[#allocation9 + $0x50] sm:$0xff] }
 0x238   :  { %4822 = vst [vmem:[#allocation29_spill] sm:$0xff] %v4257_v28  ;;  %v803_v37 = vadd.f32 %v2482_v27, %v4238_v43  ;;  %v2483_v2 = vpop.f32.mrb[24].mxu0  ;;  %3360 = vmatprep.subr.bf16.mxu1 %v3359_v29  ;;  %v4266_v44 = vpop.f32.mrb[25].mxu1  ;;  %v4803_v27 = vmax.f32 %v4257_v28, 0.0  ;;  %3402 = vmatpush3.bf16.msra.mxu0 %v3401_v23 }
 0x239   :  { %v2484_v50 = vpop.f32.mrb[25].mxu0  ;;  %3362 = vmatpush3.bf16.msra.mxu1 %v3359_v29  ;;  %3404 = vmatprep.subr.bf16.mxu0 %v3403_v20 }
 0x23a   :  { %v4268_v21 = vadd.f32 %v2988_v1, %v803_v37  ;;  %v2485_v58 = vadd.f32 %v2484_v50, %v2483_v2  ;;  %v3407_v1 = vpack.c.bf16 %v1293_v6, %v1292_v60  ;;  %v3409_v6 = vpack.c.bf16 %v1277_v57, %v1276_v35 }
 0x23b   :  { %v4270_v53 = vpop.f32.mrb[26].mxu1 }
 0x23c   :  { %4823 = vst [vmem:[#allocation30_spill] sm:$0xff] %v4268_v21  ;;  %v4802_v47 = vmax.f32 %v4268_v21, 0.0  ;;  %v808_v34 = vadd.f32 %v2485_v58, %v4238_v43  ;;  %v2486_v38 = vpop.f32.mrb[26].mxu0  ;;  %v4275_v22 = vpop.f32.mrb[27].mxu1  ;;  %v1294_v58 = vld [vmem:[#allocation9 + $0xd0] sm:$0xff]  ;;  %3406 = vmatpush3.bf16.msra.mxu0 %v3405_v16 }
 0x23d   :  { %v2487_v29 = vpop.f32.mrb[27].mxu0  ;;  %3408 = vmatprep.subr.bf16.mxu0 %v3407_v1  ;;  %v3411_v20 = vpack.c.bf16 %v1295_v54, %v1294_v58  ;;  %v1281_v58 = vld [vmem:[#allocation9 + $0x68] sm:$0xff] }
 0x23e   :  { %v4278_v37 = vadd.f32 %v4246_v9, %v808_v34  ;;  %v2488_v2 = vadd.f32 %v2487_v29, %v2486_v38  ;;  %v3363_v50 = vpack.c.bf16 %v4802_v47, %v4803_v27  ;;  %v1279_v34 = vld [vmem:[#allocation9 + $0x58] sm:$0xff]  ;;  %v1296_v47 = vld [vmem:[#allocation9 + $0xe0] sm:$0xff]  ;;  %v1297_v27 = vld [vmem:[#allocation9 + $0xe8] sm:$0xff] }
 0x23f   :  { %v4284_v46 = vpop.f32.mrb[28].mxu1  ;;  %v3413_v54 = vpack.c.bf16 %v1279_v34, %v1278_v63  ;;  %v1283_v63 = vld [vmem:[#allocation9 + $0x78] sm:$0xff] }
 0x240   :  { %v813_v23 = vadd.f32 %v2488_v2, %v4238_v43  ;;  %v2489_v17 = vpop.f32.mrb[28].mxu0  ;;  %3364 = vmatprep.subr.bf16.mxu1 %v3363_v50  ;;  %v4287_v60 = vpop.f32.mrb[29].mxu1  ;;  %v1015_v2 = vmax.f32 %v4278_v37, 0.0  ;;  %3410 = vmatpush3.bf16.msra.mxu0 %v3409_v6 }
 0x241   :  { %v2490_v9 = vpop.f32.mrb[29].mxu0  ;;  %3366 = vmatpush3.bf16.msra.mxu1 %v3363_v50  ;;  %3412 = vmatprep.subr.bf16.mxu0 %v3411_v20  ;;  %v1280_v50 = vld [vmem:[#allocation9 + $0x60] sm:$0xff] }
 0x242   :  { %v4290_v38 = vadd.f32 %v4243_v52, %v813_v23  ;;  %v2491_v29 = vadd.f32 %v2490_v9, %v2489_v17  ;;  %v3415_v52 = vpack.c.bf16 %v1297_v27, %v1296_v47  ;;  %v3417_v20 = vpack.c.bf16 %v1281_v58, %v1280_v50 }
 0x243   :  { %v4292_v55 = vpop.f32.mrb[30].mxu1 }
 0x244   :  { %v4808_v21 = vmax.f32 %v4290_v38, 0.0  ;;  %v818_v16 = vadd.f32 %v2491_v29, %v4238_v43  ;;  %v2492_v35 = vpop.f32.mrb[30].mxu0  ;;  %v4297_v57 = vpop.f32.mrb[31].mxu1  ;;  %v1298_v29 = vld [vmem:[#allocation9 + $0xf0] sm:$0xff]  ;;  %3414 = vmatpush3.bf16.msra.mxu0 %v3413_v54 }
 0x245   :  { %v2493_v1 = vpop.f32.mrb[31].mxu0  ;;  %3416 = vmatprep.subr.bf16.mxu0 %v3415_v52  ;;  %v3419_v27 = vpack.c.bf16 %v1299_v31, %v1298_v29 }
 0x246   :  { %v4300_v23 = vadd.f32 %v4255_v40, %v818_v16  ;;  %v2494_v17 = vadd.f32 %v2493_v1, %v2492_v35  ;;  %v3367_v9 = vpack.c.bf16 %v4808_v21, %v1015_v2  ;;  %v1282_v40 = vld [vmem:[#allocation9 + $0x70] sm:$0xff] }
 0x247   :  { %v3421_v54 = vpack.c.bf16 %v1283_v63, %v1282_v40 }
 0x248   :  { %v823_v28 = vadd.f32 %v2494_v17, %v4238_v43  ;;  %v2495_v6 = vpop.f32.mrb[32].mxu0  ;;  %3368 = vmatprep.subr.bf16.mxu1 %v3367_v9  ;;  %v1017_v35 = vmax.f32 %v4300_v23, 0.0  ;;  %3418 = vmatpush3.bf16.msra.mxu0 %v3417_v20  ;;  %v4837_v23 = vld [vmem:[#allocation23_spill] sm:$0xff] }
 0x249   :  { %v2496_v47 = vpop.f32.mrb[33].mxu0  ;;  %3370 = vmatpush3.bf16.msra.mxu1 %v3367_v9  ;;  %3420 = vmatprep.subr.bf16.mxu0 %v3419_v27 }
 0x24a   :  { %v4308_v34 = vadd.f32 %v4250_v48, %v823_v28  ;;  %v2497_v16 = vadd.f32 %v2496_v47, %v2495_v6 }
 0x24c   :  { %v1018_v1 = vmax.f32 %v4308_v34, 0.0  ;;  %v828_v17 = vadd.f32 %v2497_v16, %v4238_v43  ;;  %v2498_v21 = vpop.f32.mrb[34].mxu0  ;;  %3422 = vmatpush3.bf16.msra.mxu0 %v3421_v54 }
 0x24d   :  { %v2499_v50 = vpop.f32.mrb[35].mxu0 }
 0x24e   :  { %v4314_v52 = vadd.f32 %v4266_v44, %v828_v17  ;;  %v2500_v31 = vadd.f32 %v2499_v50, %v2498_v21  ;;  %v3371_v48 = vpack.c.bf16 %v1018_v1, %v1017_v35 }
 0x250   :  { %v833_v28 = vadd.f32 %v2500_v31, %v4238_v43  ;;  %v2501_v58 = vpop.f32.mrb[36].mxu0  ;;  %3372 = vmatprep.subr.bf16.mxu1 %v3371_v48  ;;  %v1019_v44 = vmax.f32 %v4314_v52, 0.0 }
 0x251   :  { %v2502_v9 = vpop.f32.mrb[37].mxu0  ;;  %3374 = vmatpush3.bf16.msra.mxu1 %v3371_v48 }
 0x252   :  { %v4322_v29 = vadd.f32 %v4263_v19, %v833_v28  ;;  %v2503_v6 = vadd.f32 %v2502_v9, %v2501_v58 }
 0x254   :  { %v1020_v21 = vmax.f32 %v4322_v29, 0.0  ;;  %v838_v20 = vadd.f32 %v2503_v6, %v4238_v43  ;;  %v2504_v47 = vpop.f32.mrb[38].mxu0 }
 0x255   :  { %v2505_v27 = vpop.f32.mrb[39].mxu0 }
 0x256   :  { %v4328_v40 = vadd.f32 %v4275_v22, %v838_v20  ;;  %v2506_v63 = vadd.f32 %v2505_v27, %v2504_v47  ;;  %v3375_v16 = vpack.c.bf16 %v1020_v21, %v1019_v44 }
 0x258   :  { %v843_v19 = vadd.f32 %v2506_v63, %v4238_v43  ;;  %v2507_v17 = vpop.f32.mrb[40].mxu0  ;;  %3376 = vmatprep.subr.bf16.mxu1 %v3375_v16  ;;  %v1021_v48 = vmax.f32 %v4328_v40, 0.0 }
 0x259   :  { %v2508_v54 = vpop.f32.mrb[41].mxu0  ;;  %3378 = vmatpush3.bf16.msra.mxu1 %v3375_v16 }
 0x25a   :  { %v4336_v50 = vadd.f32 %v4270_v53, %v843_v19  ;;  %v2509_v31 = vadd.f32 %v2508_v54, %v2507_v17 }
 0x25c   :  { %v1022_v22 = vmax.f32 %v4336_v50, 0.0  ;;  %v848_v28 = vadd.f32 %v2509_v31, %v4238_v43  ;;  %v2510_v58 = vpop.f32.mrb[42].mxu0 }
 0x25d   :  { %v2511_v9 = vpop.f32.mrb[43].mxu0 }
 0x25e   :  { %v4342_v6 = vadd.f32 %v4287_v60, %v848_v28  ;;  %v2512_v20 = vadd.f32 %v2511_v9, %v2510_v58  ;;  %v3379_v47 = vpack.c.bf16 %v1022_v22, %v1021_v48 }
 0x260   :  { %v853_v53 = vadd.f32 %v2512_v20, %v4238_v43  ;;  %v2513_v27 = vpop.f32.mrb[44].mxu0  ;;  %3380 = vmatprep.subr.bf16.mxu1 %v3379_v47  ;;  %v1023_v17 = vmax.f32 %v4342_v6, 0.0 }
 0x261   :  { %v2514_v63 = vpop.f32.mrb[45].mxu0  ;;  %3382 = vmatpush3.bf16.msra.mxu1 %v3379_v47 }
 0x262   :  { %v4350_v16 = vadd.f32 %v4284_v46, %v853_v53  ;;  %v2515_v19 = vadd.f32 %v2514_v63, %v2513_v27  ;;  %v1300_v53 = vld [vmem:[#allocation9 + $0x100] sm:$0xff]  ;;  %v1301_v27 = vld [vmem:[#allocation9 + $0x108] sm:$0xff] }
 0x264   :  { %v1024_v60 = vmax.f32 %v4350_v16, 0.0  ;;  %v858_v54 = vadd.f32 %v2515_v19, %v4238_v43  ;;  %v2516_v31 = vpop.f32.mrb[46].mxu0  ;;  %v1647_v16 = vld [vmem:[%s4779_s0] sm:$0xff] }
 0x265   :  { %v2517_v28 = vpop.f32.mrb[47].mxu0 }
 0x266   :  { %v4356_v58 = vadd.f32 %v4297_v57, %v858_v54  ;;  %v2518_v9 = vadd.f32 %v2517_v28, %v2516_v31  ;;  %v3383_v20 = vpack.c.bf16 %v1024_v60, %v1023_v17  ;;  %v3423_v54 = vpack.c.bf16 %v1301_v27, %v1300_v53  ;;  %v1302_v31 = vld [vmem:[#allocation9 + $0x110] sm:$0xff]  ;;  %v1303_v28 = vld [vmem:[#allocation9 + $0x118] sm:$0xff] }
 0x267   :  { %v1306_v27 = vld [vmem:[#allocation9 + $0x130] sm:$0xff] }
 0x268   :  { %v863_v46 = vadd.f32 %v2518_v9, %v4238_v43  ;;  %3384 = vmatprep.subr.bf16.mxu1 %v3383_v20  ;;  %v1025_v63 = vmax.f32 %v4356_v58, 0.0  ;;  %v3427_v43 = vpack.c.bf16 %v1303_v28, %v1302_v31  ;;  %v1305_v9 = vld [vmem:[#allocation9 + $0x128] sm:$0xff]  ;;  %v3565_v31 = vld [vmem:[%s4779_s0 + $0x20] sm:$0xff] }
 0x269   :  { %3386 = vmatpush3.bf16.msra.mxu1 %v3383_v20  ;;  %v3562_v20 = vld [vmem:[%s4779_s0 + $0x8] sm:$0xff]  ;;  %v1308_v28 = vld [vmem:[#allocation9 + $0x140] sm:$0xff] }
 0x26a   :  { %v4364_v47 = vadd.f32 %v4292_v55, %v863_v46  ;;  %v1304_v55 = vld [vmem:[#allocation9 + $0x120] sm:$0xff]  ;;  %v3563_v46 = vld [vmem:[%s4779_s0 + $0x10] sm:$0xff] }
 0x26b   :  { %v3431_v53 = vpack.c.bf16 %v1305_v9, %v1304_v55  ;;  %v3566_v55 = vld [vmem:[%s4779_s0 + $0x28] sm:$0xff]  ;;  %v3567_v9 = vld [vmem:[%s4779_s0 + $0x30] sm:$0xff] }
 0x26c   :  { %v4809_v57 = vmax.f32 %v4364_v47, 0.0 }
 0x26e   :  { %v3387_v19 = vpack.c.bf16 %v4809_v57, %v1025_v63  ;;  %v1307_v57 = vld [vmem:[#allocation9 + $0x138] sm:$0xff] }
 0x270   :  { %3388 = vmatprep.subr.bf16.mxu1 %v3387_v19 }
 0x271   :  { %3390 = vmatpush3.bf16.msra.mxu1 %v3387_v19  ;;  %v3564_v19 = vld [vmem:[%s4779_s0 + $0x18] sm:$0xff] }
 0x272   :  { %3424 = vmatprep.subr.bf16.mxu1 %v3423_v54 }
 0x274   :  { %3040 = vmatmul.mubr.f32.vlgmr.msra.gmra.mrb[32].mxu1 %v3562_v20  ;;  %v1309_v20 = vld [vmem:[#allocation9 + $0x148] sm:$0xff] }
 0x275   :  { %3426 = vmatpush3.bf16.msra.mxu1 %v3423_v54  ;;  %3042 = vmatprep.mubr.f32.mxu1 %v3563_v46  ;;  %v3435_v54 = vpack.c.bf16 %v1307_v57, %v1306_v27  ;;  %v1310_v46 = vld [vmem:[#allocation9 + $0x150] sm:$0xff]  ;;  %v3568_v57 = vld [vmem:[%s4779_s0 + $0x38] sm:$0xff] }
 0x276   :  { %3428 = vmatprep.subr.bf16.mxu1 %v3427_v43 }
 0x278   :  { %3043 = vmatmul.mubr.f32.gmra.mrb[34].mxu1 %v3564_v19  ;;  %v1311_v19 = vld [vmem:[#allocation9 + $0x158] sm:$0xff] }
 0x279   :  { %3430 = vmatpush3.bf16.msra.mxu1 %v3427_v43  ;;  %3045 = vmatprep.mubr.f32.mxu1 %v3565_v31  ;;  %v3439_v43 = vpack.c.bf16 %v1309_v20, %v1308_v28  ;;  %v3443_v27 = vpack.c.bf16 %v1311_v19, %v1310_v46  ;;  %v1313_v31 = vld [vmem:[#allocation9 + $0x168] sm:$0xff]  ;;  %v1314_v20 = vld [vmem:[#allocation9 + $0x170] sm:$0xff]  ;;  %v4825_v46 = vmax.f32 %v4248_v10, 0.0 }
 0x27a   :  { %3432 = vmatprep.subr.bf16.mxu1 %v3431_v53 }
 0x27c   :  { %3046 = vmatmul.mubr.f32.gmra.mrb[36].mxu1 %v3566_v55  ;;  %v1315_v55 = vld [vmem:[#allocation9 + $0x178] sm:$0xff] }
 0x27d   :  { %3434 = vmatpush3.bf16.msra.mxu1 %v3431_v53  ;;  %3048 = vmatprep.mubr.f32.mxu1 %v3567_v9  ;;  %v1312_v53 = vld [vmem:[#allocation9 + $0x160] sm:$0xff] }
 0x27e   :  { %3436 = vmatprep.subr.bf16.mxu1 %v3435_v54  ;;  %v3447_v28 = vpack.c.bf16 %v1313_v31, %v1312_v53  ;;  %v4828_v53 = vld [vmem:[#allocation17_spill] sm:$0xff] }
 0x280   :  { %3049 = vmatmul.mubr.f32.gmra.mrb[38].mxu1 %v3568_v57 }
 0x281   :  { %3438 = vmatpush3.bf16.msra.mxu1 %v3435_v54  ;;  %3051 = vmatprep.mubr.f32.mxu1 %v4035_v18  ;;  %v3451_v18 = vpack.c.bf16 %v1315_v55, %v1314_v20  ;;  %v4829_v20 = vld [vmem:[#allocation30_spill] sm:$0xff] }
 0x282   :  { %3440 = vmatprep.subr.bf16.mxu1 %v3439_v43  ;;  %v4831_v55 = vld [vmem:[#allocation18_spill] sm:$0xff] }
 0x284   :  { %3052 = vmatmul.mubr.f32.gmra.mrb[40].mxu1 %v4043_v24 }
 0x285   :  { %3442 = vmatpush3.bf16.msra.mxu1 %v3439_v43  ;;  %3054 = vmatprep.mubr.f32.mxu1 %v4049_v30 }
 0x286   :  { %3444 = vmatprep.subr.bf16.mxu1 %v3443_v27 }
 0x288   :  { %3055 = vmatmul.mubr.f32.gmra.mrb[42].mxu1 %v4057_v32 }
 0x289   :  { %3446 = vmatpush3.bf16.msra.mxu1 %v3443_v27  ;;  %3057 = vmatprep.mubr.f32.mxu1 %v4065_v36 }
 0x28a   :  { %3448 = vmatprep.subr.bf16.mxu1 %v3447_v28 }
 0x28c   :  { %3058 = vmatmul.mubr.f32.gmra.mrb[44].mxu1 %v4075_v49 }
 0x28d   :  { %3450 = vmatpush3.bf16.msra.mxu1 %v3447_v28  ;;  %3060 = vmatprep.mubr.f32.mxu1 %v4081_v45 }
 0x28e   :  { %3452 = vmatprep.subr.bf16.mxu1 %v3451_v18 }
 0x290   :  { %3061 = vmatmul.mubr.f32.gmra.mrb[46].mxu1 %v4089_v61  ;;  %v4824_v61 = vmax.f32 %v4241_v51, 0.0 }
 0x291   :  { %3454 = vmatpush3.bf16.msra.mxu1 %v3451_v18  ;;  %3095 = vmatprep.mubr.f32.mxu1 %v4122_v39 }
 0x294   :  { %3096 = vmatmul.mubr.f32.vlgmr.msra.gmra.mrb[48].mxu1 %v4119_v33 }
 0x295   :  { %3098 = vmatprep.mubr.f32.mxu1 %v4136_v56 }
 0x298   :  { %3099 = vmatmul.mubr.f32.gmra.mrb[50].mxu1 %v4130_v59 }
 0x299   :  { %3101 = vmatprep.mubr.f32.mxu1 %v4148_v7 }
 0x29c   :  { %3102 = vmatmul.mubr.f32.gmra.mrb[52].mxu1 %v4142_v62 }
 0x29d   :  { %3104 = vmatprep.mubr.f32.mxu1 %v4157_v14 }
 0x2a0   :  { %3105 = vmatmul.mubr.f32.gmra.mrb[54].mxu1 %v4161_v5 }
 0x2a1   :  { %3107 = vmatprep.mubr.f32.mxu1 %v4171_v41 }
 0x2a4   :  { %3108 = vmatmul.mubr.f32.gmra.mrb[56].mxu1 %v4175_v42 }
 0x2a5   :  { %3110 = vmatprep.mubr.f32.mxu1 %v4183_v0 }
 0x2a8   :  { %3111 = vmatmul.mubr.f32.gmra.mrb[58].mxu1 %v4187_v11 }
 0x2a9   :  { %3113 = vmatprep.mubr.f32.mxu1 %v4195_v13 }
 0x2ac   :  { %3114 = vmatmul.mubr.f32.gmra.mrb[60].mxu1 %v4199_v15 }
 0x2ad   :  { %3116 = vmatprep.mubr.f32.mxu1 %v4209_v4 }
 0x2b0   :  { %3117 = vmatmul.mubr.f32.gmra.mrb[62].mxu1 %v4213_v3 }
 0x2b1   :  { %3151 = vmatprep.mubr.f32.mxu1 %v1647_v16 }
 0x347   :  { %v3041_v24 = vpop.f32.mrb[32].mxu1 }
 0x348   :  { %v1109_v30 = vpop.f32.mrb[33].mxu1  ;;  %v1189_v36 = vmul.f32 %v3041_v24, %v4110_v25  ;;  %v4826_v25 = vld [vmem:[#allocation29_spill] sm:$0xff] }
 0x349   :  { %v1188_v32 = vmul.f32 %v1109_v30, %v4106_v8  ;;  %v4827_v27 = vmax.f32 %v4826_v25, 0.0 }
 0x34b   :  { %v3044_v49 = vpop.f32.mrb[34].mxu1  ;;  %1387 = vmatprep.mubr.f32.mxu0 %v1188_v32 }
 0x34c   :  { %v1119_v45 = vpop.f32.mrb[35].mxu1  ;;  %1388 = vmatmul.mubr.f32.vlgmr.msra.gmra.mrb[48].mxu0 %v4824_v61  ;;  %v1191_v19 = vmul.f32 %v3044_v49, %v4112_v26  ;;  %v4832_v26 = vld [vmem:[#allocation19_spill] sm:$0xff]  ;;  %v4833_v49 = vmax.f32 %v4290_v38, 0.0 }
 0x34d   :  { %1392 = vmatprep.mubr.f32.mxu0 %v1189_v36  ;;  %v1190_v54 = vmul.f32 %v1119_v45, %v4108_v12  ;;  %v4830_v12 = vmax.f32 %v4829_v20, 0.0  ;;  %v4834_v45 = vld [vmem:[#allocation20_spill] sm:$0xff] }
 0x34f   :  { %v3047_v9 = vpop.f32.mrb[36].mxu1 }
 0x350   :  { %v1129_v43 = vpop.f32.mrb[37].mxu1  ;;  %1393 = vmatmul.mubr.f32.gmra.mrb[50].mxu0 %v4825_v46  ;;  %v1193_v10 = vmul.f32 %v3047_v9, %v4831_v55  ;;  %v4835_v9 = vld [vmem:[#allocation21_spill] sm:$0xff] }
 0x351   :  { %1397 = vmatprep.mubr.f32.mxu0 %v1190_v54  ;;  %v1192_v51 = vmul.f32 %v1129_v43, %v4828_v53 }
 0x353   :  { %v3050_v8 = vpop.f32.mrb[38].mxu1 }
 0x354   :  { %v1139_v57 = vpop.f32.mrb[39].mxu1  ;;  %1398 = vmatmul.mubr.f32.gmra.mrb[52].mxu0 %v4827_v27  ;;  %v1195_v61 = vmul.f32 %v3050_v8, %v4834_v45 }
 0x355   :  { %1402 = vmatprep.mubr.f32.mxu0 %v1191_v19  ;;  %v1194_v30 = vmul.f32 %v1139_v57, %v4832_v26  ;;  %v4836_v19 = vld [vmem:[#allocation22_spill] sm:$0xff] }
 0x357   :  { %v3053_v31 = vpop.f32.mrb[40].mxu1 }
 0x358   :  { %v1149_v28 = vpop.f32.mrb[41].mxu1  ;;  %1403 = vmatmul.mubr.f32.gmra.mrb[54].mxu0 %v4830_v12  ;;  %v1197_v38 = vmul.f32 %v3053_v31, %v4836_v19  ;;  %v1991_v19 = vld [vmem:[#allocation11 + $0x8] sm:$0xff] }
 0x359   :  { %1407 = vmatprep.mubr.f32.mxu0 %v1192_v51  ;;  %v1196_v37 = vmul.f32 %v1149_v28, %v4835_v9 }
 0x35b   :  { %v3056_v18 = vpop.f32.mrb[42].mxu1 }
 0x35c   :  { %v1159_v24 = vpop.f32.mrb[43].mxu1  ;;  %1408 = vmatmul.mubr.f32.gmra.mrb[56].mxu0 %v1015_v2 }
 0x35d   :  { %1412 = vmatprep.mubr.f32.mxu0 %v1193_v10 }
 0x35f   :  { %v3059_v32 = vpop.f32.mrb[44].mxu1 }
 0x360   :  { %v1169_v36 = vpop.f32.mrb[45].mxu1  ;;  %1413 = vmatmul.mubr.f32.gmra.mrb[58].mxu0 %v4833_v49 }
 0x361   :  { %1417 = vmatprep.mubr.f32.mxu0 %v1194_v30 }
 0x363   :  { %v3062_v54 = vpop.f32.mrb[46].mxu1 }
 0x364   :  { %v1179_v43 = vpop.f32.mrb[47].mxu1  ;;  %1418 = vmatmul.mubr.f32.gmra.mrb[60].mxu0 %v1017_v35  ;;  %v1198_v35 = vmul.f32 %v1159_v24, %v4837_v23  ;;  %v4499_v24 = vld [vmem:[%s4787_s8] ss:$0 sm:$0xff]  ;;  %v2009_v23 = vld [vmem:[#allocation11 + $0x98] sm:$0xff] }
 0x365   :  { %1422 = vmatprep.mubr.f32.mxu0 %v1195_v61  ;;  %v2006_v61 = vld [vmem:[#allocation11 + $0x80] sm:$0xff] }
 0x367   :  { %v3097_v2 = vpop.f32.mrb[48].mxu1 }
 0x368   :  { %1423 = vmatmul.mubr.f32.gmra.mrb[62].mxu0 %v1018_v1  ;;  %v1534_v46 = vpop.f32.mrb[49].mxu1  ;;  %v4838_v1 = vld [vmem:[#allocation24_spill] sm:$0xff] }
 0x369   :  { %1427 = vmatprep.mubr.f32.mxu0 %v1196_v37  ;;  %v1199_v27 = vmul.f32 %v3056_v18, %v4838_v1 }
 0x36b   :  { %v4443_v57 = vpop.f32.mrb[50].mxu1 }
 0x36c   :  { %1428 = vmatmul.mubr.f32.gmra.mrb[64].mxu0 %v1019_v44  ;;  %v4447_v8 = vpop.f32.mrb[51].mxu1  ;;  %v4839_v44 = vld [vmem:[#allocation25_spill] sm:$0xff] }
 0x36d   :  { %1432 = vmatprep.mubr.f32.mxu0 %v1197_v38  ;;  %v1200_v51 = vmul.f32 %v1169_v36, %v4839_v44  ;;  %v2008_v38 = vld [vmem:[#allocation11 + $0x90] sm:$0xff] }
 0x36e   :  { %v3491_v44 = vpack.c.bf16 %v2009_v23, %v2008_v38  ;;  %v2014_v38 = vld [vmem:[#allocation11 + $0xc0] sm:$0xff]  ;;  %v2015_v23 = vld [vmem:[#allocation11 + $0xc8] sm:$0xff] }
 0x36f   :  { %v4450_v25 = vpop.f32.mrb[52].mxu1 }
 0x370   :  { %1433 = vmatmul.mubr.f32.gmra.mrb[66].mxu0 %v1020_v21  ;;  %v4454_v34 = vpop.f32.mrb[53].mxu1  ;;  %v4840_v21 = vld [vmem:[#allocation26_spill] sm:$0xff] }
 0x371   :  { %1437 = vmatprep.mubr.f32.mxu0 %v1198_v35  ;;  %v1201_v28 = vmul.f32 %v3059_v32, %v4840_v21  ;;  %v2010_v21 = vld [vmem:[#allocation11 + $0xa0] sm:$0xff] }
 0x373   :  { %v4457_v53 = vpop.f32.mrb[54].mxu1 }
 0x374   :  { %1438 = vmatmul.mubr.f32.gmra.mrb[68].mxu0 %v1021_v48  ;;  %v4461_v52 = vpop.f32.mrb[55].mxu1  ;;  %v4841_v48 = vld [vmem:[#allocation27_spill] sm:$0xff] }
 0x375   :  { %1442 = vmatprep.mubr.f32.mxu0 %v1199_v27  ;;  %v1202_v12 = vmul.f32 %v1179_v43, %v4841_v48  ;;  %v1990_v43 = vld [vmem:[#allocation11] sm:$0xff] }
 0x376   :  { %v3489_v27 = vpack.c.bf16 %v1991_v19, %v1990_v43 }
 0x377   :  { %v4464_v31 = vpop.f32.mrb[56].mxu1 }
 0x378   :  { %1443 = vmatmul.mubr.f32.gmra.mrb[70].mxu0 %v1022_v22  ;;  %v4468_v29 = vpop.f32.mrb[57].mxu1  ;;  %v4842_v22 = vld [vmem:[#allocation28_spill] sm:$0xff] }
 0x379   :  { %1447 = vmatprep.mubr.f32.mxu0 %v1200_v51  ;;  %v1203_v10 = vmul.f32 %v3062_v54, %v4842_v22  ;;  %v2007_v54 = vld [vmem:[#allocation11 + $0x88] sm:$0xff]  ;;  %v1992_v51 = vld [vmem:[#allocation11 + $0x10] sm:$0xff] }
 0x37a   :  { %v3487_v37 = vpack.c.bf16 %v2007_v54, %v2006_v61 }
 0x37b   :  { %v4471_v20 = vpop.f32.mrb[58].mxu1 }
 0x37c   :  { %1448 = vmatmul.mubr.f32.gmra.mrb[72].mxu0 %v1023_v17  ;;  %v4475_v40 = vpop.f32.mrb[59].mxu1  ;;  %v4843_v17 = vmax.f32 %v4364_v47, 0.0  ;;  %3488 = vmatprep.subr.bf16.mxu0 %v3487_v37 }
 0x37d   :  { %1452 = vmatprep.mubr.f32.mxu0 %v1201_v28  ;;  %v2011_v28 = vld [vmem:[#allocation11 + $0xa8] sm:$0xff]  ;;  %3490 = vmatpush3.bf16.msra.mxu0 %v3489_v27 }
 0x37e   :  { %3492 = vmatprep.subr.bf16.mxu0 %v3491_v44 }
 0x37f   :  { %v4478_v55 = vpop.f32.mrb[60].mxu1 }
 0x380   :  { %1453 = vmatmul.mubr.f32.gmra.mrb[74].mxu0 %v1024_v60  ;;  %v4482_v50 = vpop.f32.mrb[61].mxu1 }
 0x381   :  { %1457 = vmatprep.mubr.f32.mxu0 %v1202_v12 }
 0x383   :  { %v4485_v18 = vpop.f32.mrb[62].mxu1 }
 0x384   :  { %1458 = vmatmul.mubr.f32.gmra.mrb[76].mxu0 %v1025_v63  ;;  %v4489_v6 = vpop.f32.mrb[63].mxu1 }
 0x385   :  { %1462 = vmatprep.mubr.f32.mxu0 %v1203_v10 }
 0x388   :  { %1463 = vmatmul.mubr.f32.gmra.mrb[78].mxu0 %v4843_v17 }
 0x41f   :  { %v2615_v60 = vpop.f32.mrb[48].mxu0 }
 0x420   :  { %v2616_v26 = vpop.f32.mrb[49].mxu0 }
 0x421   :  { %v2617_v58 = vadd.f32 %v2616_v26, %v2615_v60  ;;  %v1994_v60 = vld [vmem:[#allocation11 + $0x20] sm:$0xff]  ;;  %v1995_v26 = vld [vmem:[#allocation11 + $0x28] sm:$0xff] }
 0x422   :  { %v3497_v61 = vpack.c.bf16 %v1995_v26, %v1994_v60  ;;  %v2017_v60 = vld [vmem:[#allocation11 + $0xd8] sm:$0xff] }
 0x423   :  { %v1390_v63 = vadd.f32 %v2617_v58, %v4499_v24  ;;  %v2618_v30 = vpop.f32.mrb[50].mxu0 }
 0x424   :  { %v2619_v32 = vpop.f32.mrb[51].mxu0 }
 0x425   :  { %v4502_v36 = vadd.f32 %v1534_v46, %v1390_v63  ;;  %v2620_v47 = vadd.f32 %v2619_v32, %v2618_v30  ;;  %v1993_v46 = vld [vmem:[#allocation11 + $0x18] sm:$0xff]  ;;  %v2012_v32 = vld [vmem:[#allocation11 + $0xb0] sm:$0xff] }
 0x426   :  { %v3493_v17 = vpack.c.bf16 %v1993_v46, %v1992_v51 }
 0x427   :  { %v1395_v49 = vadd.f32 %v2620_v47, %v4499_v24  ;;  %v2621_v45 = vpop.f32.mrb[52].mxu0  ;;  %v1613_v48 = vmax.f32 %v4502_v36, 0.0  ;;  %v2013_v47 = vld [vmem:[#allocation11 + $0xb8] sm:$0xff] }
 0x428   :  { %v2622_v9 = vpop.f32.mrb[53].mxu0  ;;  %3494 = vmatpush3.bf16.msra.mxu0 %v3493_v17  ;;  %v3499_v43 = vpack.c.bf16 %v2013_v47, %v2012_v32 }
 0x429   :  { %v4505_v35 = vadd.f32 %v3097_v2, %v1395_v49  ;;  %v2623_v1 = vadd.f32 %v2622_v9, %v2621_v45  ;;  %v3495_v2 = vpack.c.bf16 %v2011_v28, %v2010_v21  ;;  %v1997_v9 = vld [vmem:[#allocation11 + $0x38] sm:$0xff]  ;;  %v3503_v28 = vpack.c.bf16 %v2015_v23, %v2014_v38 }
 0x42b   :  { %v1614_v12 = vmax.f32 %v4505_v35, 0.0  ;;  %v1400_v22 = vadd.f32 %v2623_v1, %v4499_v24  ;;  %v2624_v10 = vpop.f32.mrb[54].mxu0  ;;  %3496 = vmatprep.subr.bf16.mxu0 %v3495_v2  ;;  %v2016_v2 = vld [vmem:[#allocation11 + $0xd0] sm:$0xff] }
 0x42c   :  { %v2625_v16 = vpop.f32.mrb[55].mxu0  ;;  %3498 = vmatpush3.bf16.msra.mxu0 %v3497_v61  ;;  %v3507_v47 = vpack.c.bf16 %v2017_v60, %v2016_v2 }
 0x42d   :  { %v4511_v58 = vadd.f32 %v4447_v8, %v1400_v22  ;;  %v2626_v63 = vadd.f32 %v2625_v16, %v2624_v10  ;;  %v3455_v30 = vpack.c.bf16 %v1614_v12, %v1613_v48  ;;  %v1996_v8 = vld [vmem:[#allocation11 + $0x30] sm:$0xff]  ;;  %3500 = vmatprep.subr.bf16.mxu0 %v3499_v43  ;;  %v1998_v22 = vld [vmem:[#allocation11 + $0x40] sm:$0xff]  ;;  %v1999_v10 = vld [vmem:[#allocation11 + $0x48] sm:$0xff] }
 0x42e   :  { %v3501_v46 = vpack.c.bf16 %v1997_v9, %v1996_v8  ;;  %v2019_v43 = vld [vmem:[#allocation11 + $0xe8] sm:$0xff] }
 0x42f   :  { %v1405_v49 = vadd.f32 %v2626_v63, %v4499_v24  ;;  %v2627_v45 = vpop.f32.mrb[56].mxu0  ;;  %3456 = vmatprep.subr.bf16.mxu1 %v3455_v30  ;;  %v1615_v1 = vmax.f32 %v4511_v58, 0.0 }
 0x430   :  { %v2628_v54 = vpop.f32.mrb[57].mxu0  ;;  %3458 = vmatpush3.bf16.msra.mxu1 %v3455_v30  ;;  %3502 = vmatpush3.bf16.msra.mxu0 %v3501_v46  ;;  %v3505_v30 = vpack.c.bf16 %v1999_v10, %v1998_v22  ;;  %v2002_v46 = vld [vmem:[#allocation11 + $0x60] sm:$0xff]  ;;  %v2020_v10 = vld [vmem:[#allocation11 + $0xf0] sm:$0xff] }
 0x431   :  { %v4519_v37 = vadd.f32 %v4443_v57, %v1405_v49  ;;  %v2629_v19 = vadd.f32 %v2628_v54, %v2627_v45  ;;  %3504 = vmatprep.subr.bf16.mxu0 %v3503_v28  ;;  %v2001_v49 = vld [vmem:[#allocation11 + $0x58] sm:$0xff]  ;;  %v2018_v54 = vld [vmem:[#allocation11 + $0xe0] sm:$0xff] }
 0x433   :  { %v1616_v27 = vmax.f32 %v4519_v37, 0.0  ;;  %v1410_v44 = vadd.f32 %v2629_v19, %v4499_v24  ;;  %v2630_v51 = vpop.f32.mrb[58].mxu0 }
 0x434   :  { %v2631_v21 = vpop.f32.mrb[59].mxu0  ;;  %3506 = vmatpush3.bf16.msra.mxu0 %v3505_v30  ;;  %v2005_v30 = vld [vmem:[#allocation11 + $0x78] sm:$0xff] }
 0x435   :  { %v4525_v57 = vadd.f32 %v4454_v34, %v1410_v44  ;;  %v2632_v17 = vadd.f32 %v2631_v21, %v2630_v51  ;;  %v3459_v16 = vpack.c.bf16 %v1616_v27, %v1615_v1  ;;  %v2000_v34 = vld [vmem:[#allocation11 + $0x50] sm:$0xff]  ;;  %3508 = vmatprep.subr.bf16.mxu0 %v3507_v47  ;;  %v3511_v51 = vpack.c.bf16 %v2019_v43, %v2018_v54  ;;  %v2003_v21 = vld [vmem:[#allocation11 + $0x68] sm:$0xff] }
 0x436   :  { %v3509_v23 = vpack.c.bf16 %v2001_v49, %v2000_v34  ;;  %v3513_v60 = vpack.c.bf16 %v2003_v21, %v2002_v46 }
 0x437   :  { %v1415_v26 = vadd.f32 %v2632_v17, %v4499_v24  ;;  %v2633_v63 = vpop.f32.mrb[60].mxu0  ;;  %3460 = vmatprep.subr.bf16.mxu1 %v3459_v16  ;;  %v1617_v8 = vmax.f32 %v4525_v57, 0.0  ;;  %v2021_v17 = vld [vmem:[#allocation11 + $0xf8] sm:$0xff] }
 0x438   :  { %v2634_v32 = vpop.f32.mrb[61].mxu0  ;;  %3462 = vmatpush3.bf16.msra.mxu1 %v3459_v16  ;;  %3510 = vmatpush3.bf16.msra.mxu0 %v3509_v23 }
 0x439   :  { %v4533_v45 = vadd.f32 %v4450_v25, %v1415_v26  ;;  %v2635_v61 = vadd.f32 %v2634_v32, %v2633_v63  ;;  %3512 = vmatprep.subr.bf16.mxu0 %v3511_v51  ;;  %v3515_v63 = vpack.c.bf16 %v2021_v17, %v2020_v10 }
 0x43b   :  { %v1618_v9 = vmax.f32 %v4533_v45, 0.0  ;;  %v1420_v19 = vadd.f32 %v2635_v61, %v4499_v24  ;;  %v2636_v38 = vpop.f32.mrb[62].mxu0 }
 0x43c   :  { %v2637_v44 = vpop.f32.mrb[63].mxu0  ;;  %3514 = vmatpush3.bf16.msra.mxu0 %v3513_v60 }
 0x43d   :  { %v4539_v25 = vadd.f32 %v4461_v52, %v1420_v19  ;;  %v2638_v28 = vadd.f32 %v2637_v44, %v2636_v38  ;;  %v3463_v22 = vpack.c.bf16 %v1618_v9, %v1617_v8  ;;  %v2004_v52 = vld [vmem:[#allocation11 + $0x70] sm:$0xff]  ;;  %3516 = vmatprep.subr.bf16.mxu0 %v3515_v63 }
 0x43e   :  { %v3517_v43 = vpack.c.bf16 %v2005_v30, %v2004_v52 }
 0x43f   :  { %v1425_v16 = vadd.f32 %v2638_v28, %v4499_v24  ;;  %v2639_v2 = vpop.f32.mrb[64].mxu0  ;;  %3464 = vmatprep.subr.bf16.mxu1 %v3463_v22  ;;  %v1619_v34 = vmax.f32 %v4539_v25, 0.0 }
 0x440   :  { %v2640_v26 = vpop.f32.mrb[65].mxu0  ;;  %3466 = vmatpush3.bf16.msra.mxu1 %v3463_v22  ;;  %3518 = vmatpush3.bf16.msra.mxu0 %v3517_v43 }
 0x441   :  { %v4547_v32 = vadd.f32 %v4457_v53, %v1425_v16  ;;  %v2641_v47 = vadd.f32 %v2640_v26, %v2639_v2 }
 0x443   :  { %v1620_v49 = vmax.f32 %v4547_v32, 0.0  ;;  %v1430_v61 = vadd.f32 %v2641_v47, %v4499_v24  ;;  %v2642_v54 = vpop.f32.mrb[66].mxu0 }
 0x444   :  { %v2643_v19 = vpop.f32.mrb[67].mxu0 }
 0x445   :  { %v4553_v38 = vadd.f32 %v4468_v29, %v1430_v61  ;;  %v2644_v23 = vadd.f32 %v2643_v19, %v2642_v54  ;;  %v3467_v53 = vpack.c.bf16 %v1620_v49, %v1619_v34 }
 0x447   :  { %v1435_v44 = vadd.f32 %v2644_v23, %v4499_v24  ;;  %v2645_v51 = vpop.f32.mrb[68].mxu0  ;;  %3468 = vmatprep.subr.bf16.mxu1 %v3467_v53  ;;  %v1621_v29 = vmax.f32 %v4553_v38, 0.0 }
 0x448   :  { %v2646_v46 = vpop.f32.mrb[69].mxu0  ;;  %3470 = vmatpush3.bf16.msra.mxu1 %v3467_v53 }
 0x449   :  { %v4561_v21 = vadd.f32 %v4464_v31, %v1435_v44  ;;  %v2647_v28 = vadd.f32 %v2646_v46, %v2645_v51 }
 0x44b   :  { %v1622_v22 = vmax.f32 %v4561_v21, 0.0  ;;  %v1440_v10 = vadd.f32 %v2647_v28, %v4499_v24  ;;  %v2648_v17 = vpop.f32.mrb[70].mxu0 }
 0x44c   :  { %v2649_v16 = vpop.f32.mrb[71].mxu0 }
 0x44d   :  { %v4567_v2 = vadd.f32 %v4475_v40, %v1440_v10  ;;  %v2650_v60 = vadd.f32 %v2649_v16, %v2648_v17  ;;  %v3471_v26 = vpack.c.bf16 %v1622_v22, %v1621_v29 }
 0x44f   :  { %v1445_v31 = vadd.f32 %v2650_v60, %v4499_v24  ;;  %v2651_v63 = vpop.f32.mrb[72].mxu0  ;;  %3472 = vmatprep.subr.bf16.mxu1 %v3471_v26  ;;  %v1623_v61 = vmax.f32 %v4567_v2, 0.0 }
 0x450   :  { %v2652_v52 = vpop.f32.mrb[73].mxu0  ;;  %3474 = vmatpush3.bf16.msra.mxu1 %v3471_v26 }
 0x451   :  { %v4575_v30 = vadd.f32 %v4471_v20, %v1445_v31  ;;  %v2653_v47 = vadd.f32 %v2652_v52, %v2651_v63 }
 0x453   :  { %v1624_v40 = vmax.f32 %v4575_v30, 0.0  ;;  %v1450_v54 = vadd.f32 %v2653_v47, %v4499_v24  ;;  %v2654_v43 = vpop.f32.mrb[74].mxu0 }
 0x454   :  { %v2655_v19 = vpop.f32.mrb[75].mxu0 }
 0x455   :  { %v4581_v23 = vadd.f32 %v4482_v50, %v1450_v54  ;;  %v2656_v53 = vadd.f32 %v2655_v19, %v2654_v43  ;;  %v3475_v44 = vpack.c.bf16 %v1624_v40, %v1623_v61  ;;  %v2022_v54 = vld [vmem:[#allocation11 + $0x100] sm:$0xff]  ;;  %v2023_v43 = vld [vmem:[#allocation11 + $0x108] sm:$0xff] }
 0x457   :  { %v1455_v20 = vadd.f32 %v2656_v53, %v4499_v24  ;;  %v2657_v51 = vpop.f32.mrb[76].mxu0  ;;  %3476 = vmatprep.subr.bf16.mxu1 %v3475_v44  ;;  %v1625_v17 = vmax.f32 %v4581_v23, 0.0 }
 0x458   :  { %v2658_v46 = vpop.f32.mrb[77].mxu0  ;;  %3478 = vmatpush3.bf16.msra.mxu1 %v3475_v44  ;;  %v3519_v44 = vpack.c.bf16 %v2023_v43, %v2022_v54  ;;  %v1652_v54 = vld [vmem:[%s4779_s0 + $0x28] sm:$0xff]  ;;  %v1653_v43 = vld [vmem:[%s4779_s0 + $0x30] sm:$0xff] }
 0x459   :  { %v4589_v28 = vadd.f32 %v4478_v55, %v1455_v20  ;;  %v2659_v10 = vadd.f32 %v2658_v46, %v2657_v51  ;;  %v2024_v20 = vld [vmem:[#allocation11 + $0x110] sm:$0xff]  ;;  %v2025_v51 = vld [vmem:[#allocation11 + $0x118] sm:$0xff] }
 0x45a   :  { %v3523_v46 = vpack.c.bf16 %v2025_v51, %v2024_v20  ;;  %v2031_v20 = vld [vmem:[#allocation11 + $0x148] sm:$0xff]  ;;  %v1654_v51 = vld [vmem:[%s4779_s0 + $0x38] sm:$0xff] }
 0x45b   :  { %v1626_v50 = vmax.f32 %v4589_v28, 0.0  ;;  %v1460_v16 = vadd.f32 %v2659_v10, %v4499_v24  ;;  %v2660_v60 = vpop.f32.mrb[78].mxu0  ;;  %v2026_v10 = vld [vmem:[#allocation11 + $0x120] sm:$0xff] }
 0x45c   :  { %v2661_v26 = vpop.f32.mrb[79].mxu0  ;;  %v4733_v28 = vld [vmem:[%s4788_s9] ss:$0 sm:$0xff]  ;;  %s3717_s9 = smov [#allocation12]  }
 0x45d   :  { %v4595_v31 = vadd.f32 %v4489_v6, %v1460_v16  ;;  %v2662_v63 = vadd.f32 %v2661_v26, %v2660_v60  ;;  %v3479_v52 = vpack.c.bf16 %v1626_v50, %v1625_v17  ;;  %v2027_v16 = vld [vmem:[#allocation11 + $0x128] sm:$0xff]  ;;  %v1650_v60 = vld [vmem:[%s4779_s0 + $0x18] sm:$0xff]  ;;  %v1651_v26 = vld [vmem:[%s4779_s0 + $0x20] sm:$0xff]  ;;  %s2356_s30 = sshll.u32 %s3717_s9, 4  ;;  %s2357_s30 = int_to_ptr.vmem [resolvable:$true] %s2356_s30 }
 0x45e   :  { %s3679_s11 = scalar_lea.vmem %s2357_s30, 2048  ;;  %p3684_p13 = scmp.lt.s32.totalorder %s2357_s30, %s2357_s30 }
 0x45f   :  { %v1465_v55 = vadd.f32 %v2662_v63, %v4499_v24  ;;  %3480 = vmatprep.subr.bf16.mxu1 %v3479_v52  ;;  %v1627_v19 = vmax.f32 %v4595_v31, 0.0  ;;  %v1649_v24 = vld [vmem:[%s4779_s0 + $0x10] sm:$0xff]  ;;  %v3527_v63 = vpack.c.bf16 %v2027_v16, %v2026_v10  ;;  %v2033_v10 = vld [vmem:[#allocation11 + $0x158] sm:$0xff]  ;;  %v1656_v16 = vld [vmem:[%s4779_s0 + $0x48] sm:$0xff]  ;;  %p3680_p12 = scmp.ne.s32.totalorder %s2357_s30, %s3679_s11  ;;  %p3685_p0 = scmp.lt.s32.totalorder %s3679_s11, %s3679_s11 }
 0x460   :  { %3482 = vmatpush3.bf16.msra.mxu1 %v3479_v52  ;;  %v2028_v52 = vld [vmem:[#allocation11 + $0x130] sm:$0xff] }
 0x461   :  { %v4603_v47 = vadd.f32 %v4485_v18, %v1465_v55  ;;  %v1648_v18 = vld [vmem:[%s4779_s0 + $0x8] sm:$0xff]  ;;  %v2029_v55 = vld [vmem:[#allocation11 + $0x138] sm:$0xff]  ;;  %p3686_p1 = por %p3685_p0, %p3684_p13 }
 0x463   :  { %v1628_v6 = vmax.f32 %v4603_v47, 0.0  ;;  %p3687_p2 = pnand %p3686_p1, %p3680_p12 }
 0x465   :  { %v3483_v53 = vpack.c.bf16 %v1628_v6, %v1627_v19 }
 0x467   :  { %3484 = vmatprep.subr.bf16.mxu1 %v3483_v53 }
 0x468   :  { %3486 = vmatpush3.bf16.msra.mxu1 %v3483_v53  ;;  %v3531_v53 = vpack.c.bf16 %v2029_v55, %v2028_v52  ;;  %v2035_v52 = vld [vmem:[#allocation11 + $0x168] sm:$0xff]  ;;  %v1658_v55 = vld [vmem:[%s4779_s0 + $0x58] sm:$0xff] }
 0x469   :  { %3520 = vmatprep.subr.bf16.mxu1 %v3519_v44 }
 0x46b   :  { %3152 = vmatmul.mubr.f32.vlgmr.msra.gmra.mrb[64].mxu1 %v1648_v18  ;;  %v1655_v18 = vld [vmem:[%s4779_s0 + $0x40] sm:$0xff] }
 0x46c   :  { %3522 = vmatpush3.bf16.msra.mxu1 %v3519_v44  ;;  %3154 = vmatprep.mubr.f32.mxu1 %v1649_v24  ;;  %v2030_v44 = vld [vmem:[#allocation11 + $0x140] sm:$0xff] }
 0x46d   :  { %3524 = vmatprep.subr.bf16.mxu1 %v3523_v46  ;;  %v3535_v24 = vpack.c.bf16 %v2031_v20, %v2030_v44  ;;  %v2037_v44 = vld [vmem:[#allocation11 + $0x178] sm:$0xff]  ;;  %v1660_v20 = vld [vmem:[%s4779_s0 + $0x68] sm:$0xff] }
 0x46f   :  { %3155 = vmatmul.mubr.f32.gmra.mrb[66].mxu1 %v1650_v60  ;;  %v1657_v60 = vld [vmem:[%s4779_s0 + $0x50] sm:$0xff] }
 0x470   :  { %3526 = vmatpush3.bf16.msra.mxu1 %v3523_v46  ;;  %3157 = vmatprep.mubr.f32.mxu1 %v1651_v26  ;;  %v2032_v46 = vld [vmem:[#allocation11 + $0x150] sm:$0xff] }
 0x471   :  { %3528 = vmatprep.subr.bf16.mxu1 %v3527_v63  ;;  %v3539_v26 = vpack.c.bf16 %v2033_v10, %v2032_v46 }
 0x473   :  { %3158 = vmatmul.mubr.f32.gmra.mrb[68].mxu1 %v1652_v54  ;;  %v1659_v54 = vld [vmem:[%s4779_s0 + $0x60] sm:$0xff] }
 0x474   :  { %3530 = vmatpush3.bf16.msra.mxu1 %v3527_v63  ;;  %3160 = vmatprep.mubr.f32.mxu1 %v1653_v43  ;;  %v2034_v63 = vld [vmem:[#allocation11 + $0x160] sm:$0xff] }
 0x475   :  { %3532 = vmatprep.subr.bf16.mxu1 %v3531_v53  ;;  %v3543_v43 = vpack.c.bf16 %v2035_v52, %v2034_v63 }
 0x477   :  { %3161 = vmatmul.mubr.f32.gmra.mrb[70].mxu1 %v1654_v51  ;;  %v1661_v51 = vld [vmem:[%s4779_s0 + $0x70] sm:$0xff] }
 0x478   :  { %3534 = vmatpush3.bf16.msra.mxu1 %v3531_v53  ;;  %3163 = vmatprep.mubr.f32.mxu1 %v1655_v18  ;;  %v2036_v53 = vld [vmem:[#allocation11 + $0x170] sm:$0xff] }
 0x479   :  { %3536 = vmatprep.subr.bf16.mxu1 %v3535_v24  ;;  %v3547_v18 = vpack.c.bf16 %v2037_v44, %v2036_v53 }
 0x47b   :  { %3164 = vmatmul.mubr.f32.gmra.mrb[72].mxu1 %v1656_v16 }
 0x47c   :  { %3538 = vmatpush3.bf16.msra.mxu1 %v3535_v24  ;;  %3166 = vmatprep.mubr.f32.mxu1 %v1657_v60  ;;  %v1662_v24 = vld [vmem:[%s4779_s0 + $0x78] sm:$0xff] }
 0x47d   :  { %3540 = vmatprep.subr.bf16.mxu1 %v3539_v26 }
 0x47f   :  { %3167 = vmatmul.mubr.f32.gmra.mrb[74].mxu1 %v1658_v55 }
 0x480   :  { %3542 = vmatpush3.bf16.msra.mxu1 %v3539_v26  ;;  %3169 = vmatprep.mubr.f32.mxu1 %v1659_v54 }
 0x481   :  { %3544 = vmatprep.subr.bf16.mxu1 %v3543_v43 }
 0x483   :  { %3170 = vmatmul.mubr.f32.gmra.mrb[76].mxu1 %v1660_v20 }
 0x484   :  { %3546 = vmatpush3.bf16.msra.mxu1 %v3543_v43  ;;  %3172 = vmatprep.mubr.f32.mxu1 %v1661_v51 }
 0x485   :  { %3548 = vmatprep.subr.bf16.mxu1 %v3547_v18 }
 0x487   :  { %3173 = vmatmul.mubr.f32.gmra.mrb[78].mxu1 %v1662_v24 }
 0x488   :  { %3550 = vmatpush3.bf16.msra.mxu1 %v3547_v18  ;;  %3207 = vmatprep.mubr.f32.mxu1 %v4122_v39  ;;  %v1828_v39 = vpop.permute.xlu0 %1827 }
 0x48b   :  { %3208 = vmatmul.mubr.f32.vlgmr.msra.gmra.mrb[80].mxu1 %v4119_v33 }
 0x48c   :  { %3210 = vmatprep.mubr.f32.mxu1 %v4136_v56 }
 0x48f   :  { %3211 = vmatmul.mubr.f32.gmra.mrb[82].mxu1 %v4130_v59 }
 0x490   :  { %3213 = vmatprep.mubr.f32.mxu1 %v4148_v7 }
 0x493   :  { %3214 = vmatmul.mubr.f32.gmra.mrb[84].mxu1 %v4142_v62  ;;  %v1833_v62 = vpop.permute.xlu1 %1832 }
 0x494   :  { %3216 = vmatprep.mubr.f32.mxu1 %v4157_v14 }
 0x497   :  { %3217 = vmatmul.mubr.f32.gmra.mrb[86].mxu1 %v4161_v5 }
 0x498   :  { %3219 = vmatprep.mubr.f32.mxu1 %v4171_v41  ;;  %v1838_v41 = vpop.permute.xlu0 %1837 }
 0x49b   :  { %3220 = vmatmul.mubr.f32.gmra.mrb[88].mxu1 %v4175_v42 }
 0x49c   :  { %3222 = vmatprep.mubr.f32.mxu1 %v4183_v0  ;;  %v1848_v46 = vpop.permute.xlu0 %1847 }
 0x49f   :  { %3223 = vmatmul.mubr.f32.gmra.mrb[90].mxu1 %v4187_v11 }
 0x4a0   :  { %3225 = vmatprep.mubr.f32.mxu1 %v4195_v13  ;;  %v1843_v13 = vpop.permute.xlu1 %1842  ;;  %v1858_v26 = vpop.permute.xlu0 %1857 }
 0x4a3   :  { %3226 = vmatmul.mubr.f32.gmra.mrb[92].mxu1 %v4199_v15 }
 0x4a4   :  { %3228 = vmatprep.mubr.f32.mxu1 %v4209_v4  ;;  %v1853_v16 = vpop.permute.xlu1 %1852  ;;  %v1868_v54 = vpop.permute.xlu0 %1867 }
 0x4a7   :  { %3229 = vmatmul.mubr.f32.gmra.mrb[94].mxu1 %v4213_v3 }
 0x4a8   :  { %v1863_v52 = vpop.permute.xlu1 %1862  ;;  %v1878_v25 = vpop.permute.xlu0 %1877 }
 0x4ac   :  { %v1873_v53 = vpop.permute.xlu1 %1872 }
 0x53e   :  { %v3153_v33 = vpop.f32.mrb[64].mxu1 }
 0x53f   :  { %v1746_v59 = vpop.f32.mrb[65].mxu1  ;;  %v1906_v7 = vmul.f32 %v3153_v33, %v1833_v62 }
 0x540   :  { %v1905_v56 = vmul.f32 %v1828_v39, %v1746_v59 }
 0x542   :  { %v3156_v14 = vpop.f32.mrb[66].mxu1  ;;  %2109 = vmatprep.mubr.f32.mxu0 %v1905_v56 }
 0x543   :  { %v1756_v5 = vpop.f32.mrb[67].mxu1  ;;  %2110 = vmatmul.mubr.f32.vlgmr.msra.gmra.mrb[80].mxu0 %v1613_v48  ;;  %v1908_v15 = vmul.f32 %v3156_v14, %v1843_v13 }
 0x544   :  { %2114 = vmatprep.mubr.f32.mxu0 %v1906_v7  ;;  %v1907_v42 = vmul.f32 %v1838_v41, %v1756_v5 }
 0x546   :  { %v3159_v0 = vpop.f32.mrb[68].mxu1 }
 0x547   :  { %v1766_v11 = vpop.f32.mrb[69].mxu1  ;;  %2115 = vmatmul.mubr.f32.gmra.mrb[82].mxu0 %v1614_v12  ;;  %v1910_v35 = vmul.f32 %v3159_v0, %v1853_v16 }
 0x548   :  { %2119 = vmatprep.mubr.f32.mxu0 %v1907_v42  ;;  %v1909_v36 = vmul.f32 %v1848_v46, %v1766_v11 }
 0x54a   :  { %v3162_v4 = vpop.f32.mrb[70].mxu1 }
 0x54b   :  { %v1776_v3 = vpop.f32.mrb[71].mxu1  ;;  %2120 = vmatmul.mubr.f32.gmra.mrb[84].mxu0 %v1615_v1  ;;  %v1912_v37 = vmul.f32 %v3162_v4, %v1863_v52 }
 0x54c   :  { %2124 = vmatprep.mubr.f32.mxu0 %v1908_v15  ;;  %v1911_v58 = vmul.f32 %v1858_v26, %v1776_v3 }
 0x54e   :  { %v3165_v48 = vpop.f32.mrb[72].mxu1 }
 0x54f   :  { %v1786_v10 = vpop.f32.mrb[73].mxu1  ;;  %2125 = vmatmul.mubr.f32.gmra.mrb[86].mxu0 %v1616_v27  ;;  %v1914_v45 = vmul.f32 %v3165_v48, %v1873_v53 }
 0x550   :  { %2129 = vmatprep.mubr.f32.mxu0 %v1909_v36  ;;  %v1913_v57 = vmul.f32 %v1868_v54, %v1786_v10 }
 0x552   :  { %v3168_v12 = vpop.f32.mrb[74].mxu1 }
 0x553   :  { %v1796_v60 = vpop.f32.mrb[75].mxu1  ;;  %2130 = vmatmul.mubr.f32.gmra.mrb[88].mxu0 %v1617_v8 }
 0x554   :  { %2134 = vmatprep.mubr.f32.mxu0 %v1910_v35 }
 0x556   :  { %v3171_v1 = vpop.f32.mrb[76].mxu1 }
 0x557   :  { %v1806_v63 = vpop.f32.mrb[77].mxu1  ;;  %2135 = vmatmul.mubr.f32.gmra.mrb[90].mxu0 %v1618_v9 }
 0x558   :  { %2139 = vmatprep.mubr.f32.mxu0 %v1911_v58 }
 0x55a   :  { %v3174_v27 = vpop.f32.mrb[78].mxu1 }
 0x55b   :  { %v1816_v55 = vpop.f32.mrb[79].mxu1  ;;  %2140 = vmatmul.mubr.f32.gmra.mrb[92].mxu0 %v1619_v34  ;;  %v1915_v34 = vmul.f32 %v1878_v25, %v1796_v60 }
 0x55c   :  { %2144 = vmatprep.mubr.f32.mxu0 %v1912_v37 }
 0x55e   :  { %v3209_v8 = vpop.f32.mrb[80].mxu1 }
 0x55f   :  { %2145 = vmatmul.mubr.f32.gmra.mrb[94].mxu0 %v1620_v49  ;;  %v2256_v43 = vpop.f32.mrb[81].mxu1  ;;  %v1883_v49 = vpop.permute.xlu1 %1882 }
 0x560   :  { %2149 = vmatprep.mubr.f32.mxu0 %v1913_v57  ;;  %v1916_v51 = vmul.f32 %v3168_v12, %v1883_v49 }
 0x562   :  { %v4688_v9 = vpop.f32.mrb[82].mxu1 }
 0x563   :  { %2150 = vmatmul.mubr.f32.gmra.mrb[96].mxu0 %v1621_v29  ;;  %v2266_v44 = vpop.f32.mrb[83].mxu1  ;;  %v1888_v29 = vpop.permute.xlu0 %1887 }
 0x564   :  { %2154 = vmatprep.mubr.f32.mxu0 %v1914_v45  ;;  %v1917_v24 = vmul.f32 %v1888_v29, %v1806_v63 }
 0x566   :  { %v4692_v20 = vpop.f32.mrb[84].mxu1 }
 0x567   :  { %2155 = vmatmul.mubr.f32.gmra.mrb[98].mxu0 %v1622_v22  ;;  %v4696_v32 = vpop.f32.mrb[85].mxu1  ;;  %v1893_v22 = vpop.permute.xlu1 %1892 }
 0x568   :  { %2159 = vmatprep.mubr.f32.mxu0 %v1915_v34  ;;  %v1918_v39 = vmul.f32 %v3171_v1, %v1893_v22 }
 0x56a   :  { %v4698_v18 = vpop.f32.mrb[86].mxu1 }
 0x56b   :  { %2160 = vmatmul.mubr.f32.gmra.mrb[100].mxu0 %v1623_v61  ;;  %v4702_v38 = vpop.f32.mrb[87].mxu1  ;;  %v1898_v61 = vpop.permute.xlu0 %1897 }
 0x56c   :  { %2164 = vmatprep.mubr.f32.mxu0 %v1916_v51  ;;  %v1919_v56 = vmul.f32 %v1898_v61, %v1816_v55 }
 0x56e   :  { %v4704_v33 = vpop.f32.mrb[88].mxu1 }
 0x56f   :  { %2165 = vmatmul.mubr.f32.gmra.mrb[102].mxu0 %v1624_v40  ;;  %v4708_v21 = vpop.f32.mrb[89].mxu1  ;;  %v1903_v40 = vpop.permute.xlu1 %1902 }
 0x570   :  { %2169 = vmatprep.mubr.f32.mxu0 %v1917_v24  ;;  %v1920_v7 = vmul.f32 %v3174_v27, %v1903_v40 }
 0x572   :  { %v4710_v59 = vpop.f32.mrb[90].mxu1 }
 0x573   :  { %2170 = vmatmul.mubr.f32.gmra.mrb[104].mxu0 %v1625_v17  ;;  %v4714_v2 = vpop.f32.mrb[91].mxu1 }
 0x574   :  { %2174 = vmatprep.mubr.f32.mxu0 %v1918_v39 }
 0x576   :  { %v4716_v62 = vpop.f32.mrb[92].mxu1 }
 0x577   :  { %2175 = vmatmul.mubr.f32.gmra.mrb[106].mxu0 %v1626_v50  ;;  %v4720_v30 = vpop.f32.mrb[93].mxu1 }
 0x578   :  { %2179 = vmatprep.mubr.f32.mxu0 %v1919_v56 }
 0x57a   :  { %v4722_v14 = vpop.f32.mrb[94].mxu1 }
 0x57b   :  { %2180 = vmatmul.mubr.f32.gmra.mrb[108].mxu0 %v1627_v19  ;;  %v4726_v23 = vpop.f32.mrb[95].mxu1 }
 0x57c   :  { %2184 = vmatprep.mubr.f32.mxu0 %v1920_v7 }
 0x57f   :  { %2185 = vmatmul.mubr.f32.gmra.mrb[110].mxu0 %v1628_v6 }
 0x616   :  { %v2759_v17 = vpop.f32.mrb[80].mxu0 }
 0x617   :  { %v2760_v50 = vpop.f32.mrb[81].mxu0 }
 0x618   :  { %v2761_v5 = vadd.f32 %v2760_v50, %v2759_v17 }
 0x61a   :  { %v2112_v41 = vadd.f32 %v2761_v5, %v4733_v28  ;;  %v2762_v42 = vpop.f32.mrb[82].mxu0 }
 0x61b   :  { %v2763_v0 = vpop.f32.mrb[83].mxu0 }
 0x61c   :  { %v2257_v31 = vadd.f32 %v2256_v43, %v2112_v41  ;;  %v2764_v19 = vadd.f32 %v2763_v0, %v2762_v42 }
 0x61e   :  { %2335 = vst [vmem:[#allocation12] sm:$0xff] %v2257_v31  ;;  %v2117_v11 = vadd.f32 %v2764_v19, %v4733_v28  ;;  %v2765_v13 = vpop.f32.mrb[84].mxu0 }
 0x61f   :  { %v2766_v47 = vpop.f32.mrb[85].mxu0 }
 0x620   :  { %v2262_v6 = vadd.f32 %v3209_v8, %v2117_v11  ;;  %v2767_v15 = vadd.f32 %v2766_v47, %v2765_v13 }
 0x622   :  { %2336 = vst [vmem:[#allocation12 + $0x8] sm:$0xff] %v2262_v6  ;;  %v2122_v4 = vadd.f32 %v2767_v15, %v4733_v28  ;;  %v2768_v3 = vpop.f32.mrb[86].mxu0 }
 0x623   :  { %v2769_v46 = vpop.f32.mrb[87].mxu0 }
 0x624   :  { %v2267_v36 = vadd.f32 %v2266_v44, %v2122_v4  ;;  %v2770_v48 = vadd.f32 %v2769_v46, %v2768_v3 }
 0x626   :  { %2337 = vst [vmem:[#allocation12 + $0x10] sm:$0xff] %v2267_v36  ;;  %v2127_v10 = vadd.f32 %v2770_v48, %v4733_v28  ;;  %v2771_v16 = vpop.f32.mrb[88].mxu0 }
 0x627   :  { %v2772_v35 = vpop.f32.mrb[89].mxu0 }
 0x628   :  { %v2272_v12 = vadd.f32 %v4688_v9, %v2127_v10  ;;  %v2773_v60 = vadd.f32 %v2772_v35, %v2771_v16 }
 0x62a   :  { %2338 = vst [vmem:[#allocation12 + $0x18] sm:$0xff] %v2272_v12  ;;  %v2132_v26 = vadd.f32 %v2773_v60, %v4733_v28  ;;  %v2774_v58 = vpop.f32.mrb[90].mxu0 }
 0x62b   :  { %v2775_v1 = vpop.f32.mrb[91].mxu0 }
 0x62c   :  { %v2277_v63 = vadd.f32 %v4696_v32, %v2132_v26  ;;  %v2776_v52 = vadd.f32 %v2775_v1, %v2774_v58 }
 0x62e   :  { %2339 = vst [vmem:[#allocation12 + $0x20] sm:$0xff] %v2277_v63  ;;  %v2137_v37 = vadd.f32 %v2776_v52, %v4733_v28  ;;  %v2777_v27 = vpop.f32.mrb[92].mxu0 }
 0x62f   :  { %v2778_v55 = vpop.f32.mrb[93].mxu0 }
 0x630   :  { %v2282_v54 = vadd.f32 %v4692_v20, %v2137_v37  ;;  %v2779_v57 = vadd.f32 %v2778_v55, %v2777_v27 }
 0x632   :  { %2340 = vst [vmem:[#allocation12 + $0x28] sm:$0xff] %v2282_v54  ;;  %v2142_v8 = vadd.f32 %v2779_v57, %v4733_v28  ;;  %v2780_v43 = vpop.f32.mrb[94].mxu0 }
 0x633   :  { %v2781_v53 = vpop.f32.mrb[95].mxu0 }
 0x634   :  { %v2287_v45 = vadd.f32 %v4702_v38, %v2142_v8  ;;  %v2782_v9 = vadd.f32 %v2781_v53, %v2780_v43 }
 0x636   :  { %2341 = vst [vmem:[#allocation12 + $0x30] sm:$0xff] %v2287_v45  ;;  %v2147_v44 = vadd.f32 %v2782_v9, %v4733_v28  ;;  %v2783_v25 = vpop.f32.mrb[96].mxu0 }
 0x637   :  { %v2784_v34 = vpop.f32.mrb[97].mxu0 }
 0x638   :  { %v2292_v32 = vadd.f32 %v4698_v18, %v2147_v44  ;;  %v2785_v49 = vadd.f32 %v2784_v34, %v2783_v25 }
 0x63a   :  { %2342 = vst [vmem:[#allocation12 + $0x38] sm:$0xff] %v2292_v32  ;;  %v2152_v20 = vadd.f32 %v2785_v49, %v4733_v28  ;;  %v2786_v51 = vpop.f32.mrb[98].mxu0 }
 0x63b   :  { %v2787_v29 = vpop.f32.mrb[99].mxu0 }
 0x63c   :  { %v2297_v24 = vadd.f32 %v4708_v21, %v2152_v20  ;;  %v2788_v22 = vadd.f32 %v2787_v29, %v2786_v51 }
 0x63e   :  { %2343 = vst [vmem:[#allocation12 + $0x40] sm:$0xff] %v2297_v24  ;;  %v2157_v38 = vadd.f32 %v2788_v22, %v4733_v28  ;;  %v2789_v39 = vpop.f32.mrb[100].mxu0 }
 0x63f   :  { %v2790_v61 = vpop.f32.mrb[101].mxu0 }
 0x640   :  { %v2302_v56 = vadd.f32 %v4704_v33, %v2157_v38  ;;  %v2791_v40 = vadd.f32 %v2790_v61, %v2789_v39 }
 0x642   :  { %2344 = vst [vmem:[#allocation12 + $0x48] sm:$0xff] %v2302_v56  ;;  %v2162_v18 = vadd.f32 %v2791_v40, %v4733_v28  ;;  %v2792_v7 = vpop.f32.mrb[102].mxu0 }
 0x643   :  { %v2793_v17 = vpop.f32.mrb[103].mxu0 }
 0x644   :  { %v2307_v50 = vadd.f32 %v4714_v2, %v2162_v18  ;;  %v2794_v5 = vadd.f32 %v2793_v17, %v2792_v7 }
 0x646   :  { %2345 = vst [vmem:[#allocation12 + $0x50] sm:$0xff] %v2307_v50  ;;  %v2167_v21 = vadd.f32 %v2794_v5, %v4733_v28  ;;  %v2795_v41 = vpop.f32.mrb[104].mxu0 }
 0x647   :  { %v2796_v42 = vpop.f32.mrb[105].mxu0 }
 0x648   :  { %v2312_v0 = vadd.f32 %v4710_v59, %v2167_v21  ;;  %v2797_v31 = vadd.f32 %v2796_v42, %v2795_v41 }
 0x64a   :  { %2346 = vst [vmem:[#allocation12 + $0x58] sm:$0xff] %v2312_v0  ;;  %v2172_v33 = vadd.f32 %v2797_v31, %v4733_v28  ;;  %v2798_v19 = vpop.f32.mrb[106].mxu0 }
 0x64b   :  { %v2799_v11 = vpop.f32.mrb[107].mxu0 }
 0x64c   :  { %v2317_v13 = vadd.f32 %v4720_v30, %v2172_v33  ;;  %v2800_v47 = vadd.f32 %v2799_v11, %v2798_v19 }
 0x64e   :  { %2347 = vst [vmem:[#allocation12 + $0x60] sm:$0xff] %v2317_v13  ;;  %v2177_v2 = vadd.f32 %v2800_v47, %v4733_v28  ;;  %v2801_v6 = vpop.f32.mrb[108].mxu0 }
 0x64f   :  { %v2802_v15 = vpop.f32.mrb[109].mxu0 }
 0x650   :  { %v2322_v4 = vadd.f32 %v4716_v62, %v2177_v2  ;;  %v2803_v3 = vadd.f32 %v2802_v15, %v2801_v6 }
 0x652   :  { %2348 = vst [vmem:[#allocation12 + $0x68] sm:$0xff] %v2322_v4  ;;  %v2182_v59 = vadd.f32 %v2803_v3, %v4733_v28  ;;  %v2804_v46 = vpop.f32.mrb[110].mxu0 }
 0x653   :  { %v2805_v36 = vpop.f32.mrb[111].mxu0 }
 0x654   :  { %v2327_v48 = vadd.f32 %v4726_v23, %v2182_v59  ;;  %v2806_v10 = vadd.f32 %v2805_v36, %v2804_v46 }
 0x656   :  { %2349 = vst [vmem:[#allocation12 + $0x70] sm:$0xff] %v2327_v48  ;;  %v2187_v30 = vadd.f32 %v2806_v10, %v4733_v28 }
 0x658   :  { %v2332_v16 = vadd.f32 %v4722_v14, %v2187_v30 }
 0x65a   :  { %2350 = vst [vmem:[#allocation12 + $0x78] sm:$0xff] %v2332_v16 }
 0x65b   :  { %3690 = shalt.err (!%p3687_p2)
}
 0x65c   :  { %s3691_s16 = scalar_lea.hbm %s4789_s10, 2048 }
 0x65d   :  { %p3692_p3 = scmp.ne.s32.totalorder %s4789_s10, %s3691_s16  ;;  %p3695_p4 = scmp.lt.u32.totalorder %s3691_s16, %s4789_s10 }
 0x65f   :  { %p3697_p5 = pnand %p3695_p4, %p3692_p3 }
 0x661   :  { %3700 = shalt.err (!%p3697_p5)
}
 0x662   :  { %2362 = dma.vmem_to_hbm [thread:$0]  %s2357_s30, 2048, %s4789_s10, [#allocation5], %s3711_s25, %s3711_s25, %s3712_s26  }
 0x663   :  { %3707 = dma.done.wait [#allocation5], 2048  }
 0x664   :  { %3708 = vsyncadd [#allocation5], 4294965248 }
 0x665   :  { %2366 = vsyncpa [#allocation4], 1 }
 0x666   :  { %2367 = vsyncpa [#allocation7], 1 }
 0x667   :  { %2368 = vsyncpa [#allocation10], 1 }
 0x668   :  { %2369 = vsyncpa [#allocation5], 1 }

</bundles_post_ra>
